<compile_context>
chip_gen: v6e
topology: v6e:2x2x1
jax: 0.10.0
libtpu: 0.0.40
codegen_flags: <defaults>
</compile_context>

<pallas_src>
import functools
import math

import jax
import jax.numpy as jnp
from jax.experimental import pallas as pl
from jax.experimental.pallas import tpu as pltpu

EPS = 1e-5
NEG_SLOPE = 0.1

_VMEM_LIMIT = 40 * 1024 * 1024    # scoped-VMEM limit handed to Mosaic (v7x: 64 MiB/TC)
_VMEM_BUDGET = 24 * 1024 * 1024   # tile-derivation budget (headroom vs. the limit)

# ConvTranspose2d(k=4, s=2, p=1): oh = 2*ih - 1 + kh.  For output parity p (oh = 2a+p)
# the two contributing taps are kh in _KH[p], read from input row ih = a + dh with
# dh in _DH[p] (same mapping along the width axis).
_KH = {0: (1, 3), 1: (2, 0)}
_DH = {0: (0, -1), 1: (0, 1)}


def _pack_weight(weight, dtype):
    """(Cin, Cout, 4, 4) ConvTranspose2d weight -> (2, 2, Cout, 4*Cin): one fused
    channel-major (Cout, 4*Cin) matmul operand per output-pixel parity (p, q)."""
    w_k = jnp.transpose(weight, (2, 3, 1, 0)).astype(jnp.float32)  # (kh, kw, Cout, Cin)
    rows = []
    for p in (0, 1):
        cols = []
        for q in (0, 1):
            slabs = [w_k[_KH[p][i], _KH[q][j]] for i in (0, 1) for j in (0, 1)]
            cols.append(jnp.concatenate(slabs, axis=1))            # (Cout, 4*Cin)
        rows.append(jnp.stack(cols, axis=0))
    return jnp.stack(rows, axis=0).astype(dtype)                   # (2, 2, Cout, 4*Cin)


def _deconv_pass1_kernel(x_ref, w_ref, y_ref, stats_ref):
    # x_ref:     (1, Cin, H+2, W+2)  zero-padded channel-major input, one image
    # w_ref:     (2, 2, TC, 4*Cin)   packed weights for this output-channel block
    # y_ref:     (1, 4, TC, H*W)     un-normalized deconv output, parity-major
    # stats_ref: (1, TC, 2)          per-(image, channel-block) [sum, sum-of-squares]
    cin = x_ref.shape[1]
    H = x_ref.shape[2] - 2
    W = x_ref.shape[3] - 2
    tc = w_ref.shape[2]
    HW = H * W

    # The 9 distinct shifted views of the padded tile, computed once (CSE across the
    # 16 (parity, tap) uses).  Channel-major: Cin on sublanes, H*W on lanes.
    shifts = {}
    for dh in (-1, 0, 1):
        for dw in (-1, 0, 1):
            shifts[(dh, dw)] = x_ref[
                0, :, 1 + dh:1 + dh + H, 1 + dw:1 + dw + W].reshape(cin, HW)

    ssum = jnp.zeros((tc, 1), jnp.float32)
    ssq = jnp.zeros((tc, 1), jnp.float32)
    for p in (0, 1):
        for q in (0, 1):
            # Fuse the 4 contributing taps of this parity into a single MXU matmul
            # whose result is already channel-major -> no result transpose.
            lhs = jnp.concatenate(
                [shifts[(_DH[p][i], _DH[q][j])] for i in (0, 1) for j in (0, 1)],
                axis=0)                                            # (4*Cin, H*W)
            ypq = jnp.dot(w_ref[p, q], lhs,
                          preferred_element_type=jnp.float32)      # (TC, H*W)
            ssum += jnp.sum(ypq, axis=1, keepdims=True)
            ssq += jnp.sum(ypq * ypq, axis=1, keepdims=True)
            # Contiguous, unmasked (TC, H*W) slab store; the (p,q)->(2H,2W) interleave
            # is deferred to the HBM-bound pass 2.
            y_ref[0, 2 * p + q] = ypq.astype(y_ref.dtype)

    stats_ref[0] = jnp.concatenate([ssum, ssq], axis=1)            # (TC, 2)


def _bn_lrelu_interleave_concat_kernel(y_ref, skip_ref, scale_ref, offset_ref,
                                       out_ref, *, W):
    # y_ref:        (1, 4, Cout, THW)  parity-major un-normalized deconv output
    # skip_ref:     (1, Cs, 4*THW)     skip tensor (NCHW, spatial flattened)
    # scale/offset: (Cout, 1)          folded BatchNorm affine
    # out_ref:      (1, Cout+Cs, 4*THW)
    cout = y_ref.shape[2]
    thw = y_ref.shape[3]
    rows = thw // W

    y = y_ref[0].astype(jnp.float32)                               # (4, Cout, THW)
    yn = y * scale_ref[...][None] + offset_ref[...][None]
    yl = jnp.where(yn > 0, yn, NEG_SLOPE * yn)

    # Parity interleave: out[c, 2a+p, 2b+q] = yl[2p+q, c, a, b].  Pure shuffle work
    # that hides under the DMA stream of this memory-bound pass.
    y4 = yl.reshape(4, cout, rows, W)
    row0 = jnp.stack([y4[0], y4[1]], axis=-1).reshape(cout, rows, 2 * W)
    row1 = jnp.stack([y4[2], y4[3]], axis=-1).reshape(cout, rows, 2 * W)
    ynchw = jnp.stack([row0, row1], axis=2).reshape(cout, 4 * thw)

    sk = skip_ref[0].astype(jnp.float32)
    if cout % 8 == 0:
        # Sublane-aligned channel split -> two unmasked stores.
        out_ref[0, :cout, :] = ynchw.astype(out_ref.dtype)
        out_ref[0, cout:, :] = sk.astype(out_ref.dtype)
    else:
        # Misaligned split (toy channel counts): one full-tile store instead.
        out_ref[0] = jnp.concatenate([ynchw, sk], axis=0).astype(out_ref.dtype)


def _pick_channel_tile(cout, n_batch, vmem_fn, budget):
    """Largest multiple-of-8 divisor of Cout (<=128: MXU/v5e friendly) whose pass-1
    working set fits the VMEM budget; keeps >=2 channel blocks when N == 1 so both
    TensorCores of a v7x megacore get work."""
    cands = [d for d in range(8, cout + 1, 8) if cout % d == 0] or [cout]
    small = [d for d in cands if d <= 128] or [min(cands)]
    if n_batch == 1:
        multi = [d for d in small if cout // d >= 2]
        if multi:
            small = multi
    fit = [d for d in small if vmem_fn(d) <= budget]
    # TODO(synk): for very large H*W even the smallest channel block can exceed the
    # budget; a halo'd spatial grid axis on pass 1 would be needed in that regime.
    return max(fit) if fit else min(small)


def _pick_spatial_tile(hw, w, n_batch, vmem_fn, budget, target=2048):
    """Pass-2 spatial tile (input-pixel units, whole rows): must be a multiple of
    lcm(W, 128) dividing H*W (lane alignment of both the parity planes and the 4x
    wider output block) or the full H*W; sized from the VMEM budget and kept >= 2
    blocks when N == 1 (megacore).  If no candidate fits the budget the smallest one
    is used and the compiler's scoped-VMEM limit will fail loudly rather than OOM."""
    step = w * 128 // math.gcd(w, 128)
    cands = sorted({d for d in range(step, hw + 1, step) if hw % d == 0} | {hw})
    fit = [d for d in cands if vmem_fn(d) <= budget] or [min(cands)]
    pref = [d for d in fit if d <= target] or [min(fit)]
    if n_batch == 1:
        multi = [d for d in pref if hw // d >= 2]
        if multi:
            pref = multi
    return max(pref)


def deconv4x4_forward(x_nchw, skip_nchw, weight, gamma, beta,
                      *, compute_dtype=jnp.float32):
    """PyTorch-equivalent forward.  x: (N, Cin, H, W), skip: (N, Cs, 2H, 2W),
    weight: (Cin, Cout, 4, 4) [ConvTranspose2d layout], gamma/beta: (Cout,).
    Returns (N, Cout+Cs, 2H, 2W) float32 in NCHW.  compute_dtype=bfloat16 runs the
    MXU operands and the large intermediate in bf16 (f32 accumulation / BN stats)."""
    N, Cin, H, W = map(int, x_nchw.shape)
    Cout = int(weight.shape[1])
    Cs = int(skip_nchw.shape[1])
    HW = H * W
    S = 4 * HW                          # flattened output spatial size (2H * 2W)
    eb = jnp.dtype(compute_dtype).itemsize

    # Small-input glue: x is already NCHW = channel-major, so only a one-pixel zero
    # pad is needed (replaces 9 in-kernel OOB checks and keeps Cin on sublanes /
    # spatial on lanes for the matmul -- no NHWC transpose at all).
    x_pad = jnp.pad(x_nchw.astype(compute_dtype),
                    ((0, 0), (0, 0), (1, 1), (1, 1)))
    w_packed = _pack_weight(weight, compute_dtype)                 # (2, 2, Cout, 4*Cin)

    def p1_vmem(tc):                    # rough per-step working set of pass 1
        io = 2 * (Cin * (H + 2) * (W + 2) + 16 * Cin * tc + 4 * tc * HW) * eb
        tmp = 13 * Cin * HW * eb + tc * HW * 4      # 9 shifts + lhs, f32 ypq
        return io + tmp + 2 * tc * 2 * 4

    tc = _pick_channel_tile(Cout, N, p1_vmem, _VMEM_BUDGET)
    c_blocks = Cout // tc

    # Grid order: keep the larger per-block operand's index constant on the inner axis
    # so it stays VMEM-resident (Pallas skips the repeated DMA).
    w_bytes = 16 * Cin * Cout * eb
    x_bytes = Cin * (H + 2) * (W + 2) * eb
    weight_resident = (N - 1) * w_bytes > (c_blocks - 1) * N * x_bytes
    if weight_resident:                 # n inner -> weight block resident
        grid1 = (c_blocks, N)
        x_map = lambda c, n: (n, 0, 0, 0)
        w_map = lambda c, n: (0, 0, c, 0)
        y_map = lambda c, n: (n, 0, c, 0)
        s_map = lambda c, n: (n, c, 0)
    else:                               # c inner -> padded input resident
        grid1 = (N, c_blocks)
        x_map = lambda n, c: (n, 0, 0, 0)
        w_map = lambda n, c: (0, 0, c, 0)
        y_map = lambda n, c: (n, 0, c, 0)
        s_map = lambda n, c: (n, c, 0)

    y_pm, stats = pl.pallas_call(
        _deconv_pass1_kernel,
        out_shape=(jax.ShapeDtypeStruct((N, 4, Cout, HW), compute_dtype),
                   jax.ShapeDtypeStruct((N, Cout, 2), jnp.float32)),
        grid_spec=pltpu.PrefetchScalarGridSpec(
            num_scalar_prefetch=0,
            grid=grid1,
            in_specs=[
                pl.BlockSpec((1, Cin, H + 2, W + 2), x_map),
                pl.BlockSpec((2, 2, tc, 4 * Cin), w_map),
            ],
            out_specs=(
                pl.BlockSpec((1, 4, tc, HW), y_map),
                pl.BlockSpec((1, tc, 2), s_map),
            )),
        compiler_params=pltpu.CompilerParams(
            dimension_semantics=("parallel", "parallel"),
            vmem_limit_bytes=_VMEM_LIMIT),
    )(x_pad, w_packed)

    # BatchNorm2d training-mode statistics (global over N and all output pixels),
    # finalized on tiny (Cout,) vectors outside the kernels.
    count = jnp.float32(N * S)
    tot = jnp.sum(stats, axis=0)                               # (Cout, 2)
    mean = tot[:, 0] / count
    var = jnp.maximum(tot[:, 1] / count - mean * mean, 0.0)    # biased, torch BN style
    # TODO(synk): E[y^2]-E[y]^2 loses precision at very large N*H*W; a second centered
    # stats pass would be exact if tolerances tighten.
    inv = jax.lax.rsqrt(var + EPS)
    g = gamma.astype(jnp.float32)
    scale = (g * inv).reshape(Cout, 1)
    offset = (beta.astype(jnp.float32) - mean * g * inv).reshape(Cout, 1)

    skip_flat = skip_nchw.reshape(N, Cs, S).astype(jnp.float32)  # metadata-only

    def p2_vmem(thw):                   # rough per-step working set of pass 2
        io = 2 * (4 * Cout * thw * eb + Cs * 4 * thw * 4 + (Cout + Cs) * 4 * thw * 4)
        tmp = 2 * 4 * Cout * thw * 4 + (Cout + Cs) * 4 * thw * 4
        return io + tmp + 4 * Cout * 4

    thw = _pick_spatial_tile(HW, W, N, p2_vmem, _VMEM_BUDGET)
    s_blocks = HW // thw
    ts = 4 * thw                        # lane-dense output-spatial block

    out_flat = pl.pallas_call(
        functools.partial(_bn_lrelu_interleave_concat_kernel, W=W),
        out_shape=jax.ShapeDtypeStruct((N, Cout + Cs, S), jnp.float32),
        grid_spec=pltpu.PrefetchScalarGridSpec(
            num_scalar_prefetch=0,
            grid=(N, s_blocks),
            in_specs=[
                pl.BlockSpec((1, 4, Cout, thw), lambda n, s: (n, 0, 0, s)),
                pl.BlockSpec((1, Cs, ts), lambda n, s: (n, 0, s)),
                pl.BlockSpec((Cout, 1), lambda n, s: (0, 0)),
                pl.BlockSpec((Cout, 1), lambda n, s: (0, 0)),
            ],
            out_specs=pl.BlockSpec((1, Cout + Cs, ts), lambda n, s: (n, 0, s))),
        compiler_params=pltpu.CompilerParams(
            dimension_semantics=("parallel", "parallel"),
            vmem_limit_bytes=_VMEM_LIMIT),
    )(y_pm, skip_flat, scale, offset)

    # Free (contiguous-split) reshape back to NCHW.
    return out_flat.reshape(N, Cout + Cs, 2 * H, 2 * W)


def _reference_forward(x, skip, weight, gamma, beta):
    """Pure-JAX reference of the PyTorch module (NCHW, f32)."""
    N, Cin, H, W = x.shape
    Cout = weight.shape[1]
    full = jnp.zeros((N, Cout, 2 * H + 2, 2 * W + 2), jnp.float32)
    for kh in range(4):
        for kw in range(4):
            contrib = jnp.einsum('nihw,io->nohw', x, weight[:, :, kh, kw])
            full = full.at[:, :, kh:kh + 2 * H:2, kw:kw + 2 * W:2].add(contrib)
    y = full[:, :, 1:2 * H + 1, 1:2 * W + 1]
    mean = y.mean(axis=(0, 2, 3), keepdims=True)
    var = y.var(axis=(0, 2, 3), keepdims=True)        # biased, like torch BN training
    yn = (y - mean) / jnp.sqrt(var + EPS) * gamma.reshape(1, -1, 1, 1) \
         + beta.reshape(1, -1, 1, 1)
    yl = jnp.where(yn > 0, yn, NEG_SLOPE * yn)
    return jnp.concatenate([yl, skip], axis=1)


if __name__ == "__main__":
    key = jax.random.PRNGKey(0)

    configs = [
        # (N, in_c, out_c, skip_c, H, W, default_bn_affine, compute_dtype, tol)
        (2, 4, 4, 4, 16, 16, True, jnp.float32, 1e-3),
        (1, 8, 16, 4, 8, 8, False, jnp.float32, 1e-3),
        (2, 4, 8, 4, 16, 16, False, jnp.bfloat16, 5e-2),   # bf16 MXU + bf16 intermediate
    ]
    for (N, in_c, out_c, skip_c, H, W, default_affine, cdt, tol) in configs:
        key, k1, k2, k3, k4, k5 = jax.random.split(key, 6)
        x = jax.random.normal(k1, (N, in_c, H, W), jnp.float32)
        skip = jax.random.normal(k2, (N, skip_c, 2 * H, 2 * W), jnp.float32)
        # ConvTranspose2d weight layout: (in_c, out_c, 4, 4), no bias.
        weight = 0.1 * jax.random.normal(k3, (in_c, out_c, 4, 4), jnp.float32)
        if default_affine:
            gamma = jnp.ones((out_c,), jnp.float32)       # BatchNorm2d default init
            beta = jnp.zeros((out_c,), jnp.float32)
        else:
            gamma = 1.0 + 0.1 * jax.random.normal(k4, (out_c,), jnp.float32)
            beta = 0.1 * jax.random.normal(k5, (out_c,), jnp.float32)

        out = jax.block_until_ready(
            deconv4x4_forward(x, skip, weight, gamma, beta, compute_dtype=cdt))
        ref = _reference_forward(x, skip, weight, gamma, beta)
        assert out.shape == (N, out_c + skip_c, 2 * H, 2 * W), out.shape
        max_err = float(jnp.max(jnp.abs(out - ref)))
        assert jnp.allclose(out, ref, rtol=tol, atol=tol), (str(cdt), max_err)

    print("KERNEL_OK")
</pallas_src>

<mosaic_0001>
module attributes {stable_mosaic.version = 11 : i64} {
  func.func @_deconv_pass1_kernel(%arg0: i32, %arg1: i32, %arg2: memref<1x4x18x18xf32, #tpu.memory_space<vmem>>, %arg3: memref<2x2x4x16xf32, #tpu.memory_space<vmem>>, %arg4: memref<1x4x4x256xf32, #tpu.memory_space<vmem>>, %arg5: memref<1x4x2xf32, #tpu.memory_space<vmem>>) attributes {dimension_semantics = [#tpu.dimension_semantics<parallel>, #tpu.dimension_semantics<parallel>], iteration_bounds = array<i64: 1, 2>, scalar_prefetch = 0 : i64, scratch_operands = 0 : i64, tpu.core_type = #tpu.core_type<tc>, window_params = [{transform_indices = @transform_0, window_bounds = array<i64: 1, 4, 18, 18>}, {transform_indices = @transform_1, window_bounds = array<i64: 2, 2, 4, 16>}, {transform_indices = @transform_2, window_bounds = array<i64: 1, 4, 4, 256>}, {transform_indices = @transform_3, window_bounds = array<i64: 1, 4, 2>}]} {
    %c0 = arith.constant 0 : index
    %c0_0 = arith.constant 0 : index
    %c0_1 = arith.constant 0 : index
    %c0_2 = arith.constant 0 : index
    %0 = vector.load %arg2[%c0, %c0_0, %c0_1, %c0_2] : memref<1x4x18x18xf32, #tpu.memory_space<vmem>>, vector<1x4x16x16xf32>
    %1 = vector.shape_cast %0 : vector<1x4x16x16xf32> to vector<4x16x16xf32>
    %2 = vector.shape_cast %1 : vector<4x16x16xf32> to vector<4x256xf32>
    %c0_3 = arith.constant 0 : index
    %c0_4 = arith.constant 0 : index
    %c0_5 = arith.constant 0 : index
    %c1 = arith.constant 1 : index
    %3 = vector.load %arg2[%c0_3, %c0_4, %c0_5, %c1] : memref<1x4x18x18xf32, #tpu.memory_space<vmem>>, vector<1x4x16x16xf32>
    %4 = vector.shape_cast %3 : vector<1x4x16x16xf32> to vector<4x16x16xf32>
    %5 = vector.shape_cast %4 : vector<4x16x16xf32> to vector<4x256xf32>
    %c0_6 = arith.constant 0 : index
    %c0_7 = arith.constant 0 : index
    %c0_8 = arith.constant 0 : index
    %c2 = arith.constant 2 : index
    %6 = vector.load %arg2[%c0_6, %c0_7, %c0_8, %c2] : memref<1x4x18x18xf32, #tpu.memory_space<vmem>>, vector<1x4x16x16xf32>
    %7 = vector.shape_cast %6 : vector<1x4x16x16xf32> to vector<4x16x16xf32>
    %8 = vector.shape_cast %7 : vector<4x16x16xf32> to vector<4x256xf32>
    %c0_9 = arith.constant 0 : index
    %c0_10 = arith.constant 0 : index
    %c1_11 = arith.constant 1 : index
    %c0_12 = arith.constant 0 : index
    %9 = vector.load %arg2[%c0_9, %c0_10, %c1_11, %c0_12] : memref<1x4x18x18xf32, #tpu.memory_space<vmem>>, vector<1x4x16x16xf32>
    %10 = vector.shape_cast %9 : vector<1x4x16x16xf32> to vector<4x16x16xf32>
    %11 = vector.shape_cast %10 : vector<4x16x16xf32> to vector<4x256xf32>
    %c0_13 = arith.constant 0 : index
    %c0_14 = arith.constant 0 : index
    %c1_15 = arith.constant 1 : index
    %c1_16 = arith.constant 1 : index
    %12 = vector.load %arg2[%c0_13, %c0_14, %c1_15, %c1_16] : memref<1x4x18x18xf32, #tpu.memory_space<vmem>>, vector<1x4x16x16xf32>
    %13 = vector.shape_cast %12 : vector<1x4x16x16xf32> to vector<4x16x16xf32>
    %14 = vector.shape_cast %13 : vector<4x16x16xf32> to vector<4x256xf32>
    %c0_17 = arith.constant 0 : index
    %c0_18 = arith.constant 0 : index
    %c1_19 = arith.constant 1 : index
    %c2_20 = arith.constant 2 : index
    %15 = vector.load %arg2[%c0_17, %c0_18, %c1_19, %c2_20] : memref<1x4x18x18xf32, #tpu.memory_space<vmem>>, vector<1x4x16x16xf32>
    %16 = vector.shape_cast %15 : vector<1x4x16x16xf32> to vector<4x16x16xf32>
    %17 = vector.shape_cast %16 : vector<4x16x16xf32> to vector<4x256xf32>
    %c0_21 = arith.constant 0 : index
    %c0_22 = arith.constant 0 : index
    %c2_23 = arith.constant 2 : index
    %c0_24 = arith.constant 0 : index
    %18 = vector.load %arg2[%c0_21, %c0_22, %c2_23, %c0_24] : memref<1x4x18x18xf32, #tpu.memory_space<vmem>>, vector<1x4x16x16xf32>
    %19 = vector.shape_cast %18 : vector<1x4x16x16xf32> to vector<4x16x16xf32>
    %20 = vector.shape_cast %19 : vector<4x16x16xf32> to vector<4x256xf32>
    %c0_25 = arith.constant 0 : index
    %c0_26 = arith.constant 0 : index
    %c2_27 = arith.constant 2 : index
    %c1_28 = arith.constant 1 : index
    %21 = vector.load %arg2[%c0_25, %c0_26, %c2_27, %c1_28] : memref<1x4x18x18xf32, #tpu.memory_space<vmem>>, vector<1x4x16x16xf32>
    %22 = vector.shape_cast %21 : vector<1x4x16x16xf32> to vector<4x16x16xf32>
    %23 = vector.shape_cast %22 : vector<4x16x16xf32> to vector<4x256xf32>
    %c0_29 = arith.constant 0 : index
    %c0_30 = arith.constant 0 : index
    %c2_31 = arith.constant 2 : index
    %c2_32 = arith.constant 2 : index
    %24 = vector.load %arg2[%c0_29, %c0_30, %c2_31, %c2_32] : memref<1x4x18x18xf32, #tpu.memory_space<vmem>>, vector<1x4x16x16xf32>
    %25 = vector.shape_cast %24 : vector<1x4x16x16xf32> to vector<4x16x16xf32>
    %26 = vector.shape_cast %25 : vector<4x16x16xf32> to vector<4x256xf32>
    %cst = arith.constant 0.000000e+00 : f32
    %27 = vector.broadcast %cst : f32 to vector<4x1xf32>
    %cst_33 = arith.constant 0.000000e+00 : f32
    %28 = vector.broadcast %cst_33 : f32 to vector<4x1xf32>
    %29 = tpu.concatenate %14, %11, %5, %2 in 0 : vector<4x256xf32>, vector<4x256xf32>, vector<4x256xf32>, vector<4x256xf32> -> vector<16x256xf32>
    %c0_34 = arith.constant 0 : index
    %c0_35 = arith.constant 0 : index
    %c0_36 = arith.constant 0 : index
    %c0_37 = arith.constant 0 : index
    %30 = vector.load %arg3[%c0_34, %c0_35, %c0_36, %c0_37] : memref<2x2x4x16xf32, #tpu.memory_space<vmem>>, vector<1x1x4x16xf32>
    %31 = vector.shape_cast %30 : vector<1x1x4x16xf32> to vector<4x16xf32>
    %cst_38 = arith.constant dense<0.000000e+00> : vector<4x256xf32>
    %32 = tpu.matmul %31, %29, %cst_38 {dimension_numbers = #tpu.dot_dimension_numbers<[1], [0], [0], [1], [0, 0, 1, 1], [], []>} : vector<4x16xf32>, vector<16x256xf32>, vector<4x256xf32> -> vector<4x256xf32>
    %cst_39 = arith.constant dense<0.000000e+00> : vector<4xf32>
    %33 = vector.multi_reduction <add>, %32, %cst_39 [1] : vector<4x256xf32> to vector<4xf32>
    %34 = vector.shape_cast %33 : vector<4xf32> to vector<4x1xf32>
    %35 = arith.addf %27, %34 : vector<4x1xf32>
    %36 = arith.mulf %32, %32 : vector<4x256xf32>
    %cst_40 = arith.constant dense<0.000000e+00> : vector<4xf32>
    %37 = vector.multi_reduction <add>, %36, %cst_40 [1] : vector<4x256xf32> to vector<4xf32>
    %38 = vector.shape_cast %37 : vector<4xf32> to vector<4x1xf32>
    %39 = arith.addf %28, %38 : vector<4x1xf32>
    %c0_41 = arith.constant 0 : index
    %c0_42 = arith.constant 0 : index
    %c0_43 = arith.constant 0 : index
    %c0_44 = arith.constant 0 : index
    %40 = vector.load %arg4[%c0_41, %c0_42, %c0_43, %c0_44] : memref<1x4x4x256xf32, #tpu.memory_space<vmem>>, vector<1x1x4x256xf32>
    %41 = vector.shape_cast %40 : vector<1x1x4x256xf32> to vector<4x256xf32>
    %42 = vector.shape_cast %32 : vector<4x256xf32> to vector<1x1x4x256xf32>
    tpu.vector_store %arg4[%c0_41, %c0_42, %c0_43, %c0_44], %42 {strides = array<i32>} : memref<1x4x4x256xf32, #tpu.memory_space<vmem>>, vector<1x1x4x256xf32>,
    %43 = tpu.concatenate %14, %17, %5, %8 in 0 : vector<4x256xf32>, vector<4x256xf32>, vector<4x256xf32>, vector<4x256xf32> -> vector<16x256xf32>
    %c0_45 = arith.constant 0 : index
    %c1_46 = arith.constant 1 : index
    %c0_47 = arith.constant 0 : index
    %c0_48 = arith.constant 0 : index
    %44 = vector.load %arg3[%c0_45, %c1_46, %c0_47, %c0_48] : memref<2x2x4x16xf32, #tpu.memory_space<vmem>>, vector<1x1x4x16xf32>
    %45 = vector.shape_cast %44 : vector<1x1x4x16xf32> to vector<4x16xf32>
    %cst_49 = arith.constant dense<0.000000e+00> : vector<4x256xf32>
    %46 = tpu.matmul %45, %43, %cst_49 {dimension_numbers = #tpu.dot_dimension_numbers<[1], [0], [0], [1], [0, 0, 1, 1], [], []>} : vector<4x16xf32>, vector<16x256xf32>, vector<4x256xf32> -> vector<4x256xf32>
    %cst_50 = arith.constant dense<0.000000e+00> : vector<4xf32>
    %47 = vector.multi_reduction <add>, %46, %cst_50 [1] : vector<4x256xf32> to vector<4xf32>
    %48 = vector.shape_cast %47 : vector<4xf32> to vector<4x1xf32>
    %49 = arith.addf %35, %48 : vector<4x1xf32>
    %50 = arith.mulf %46, %46 : vector<4x256xf32>
    %cst_51 = arith.constant dense<0.000000e+00> : vector<4xf32>
    %51 = vector.multi_reduction <add>, %50, %cst_51 [1] : vector<4x256xf32> to vector<4xf32>
    %52 = vector.shape_cast %51 : vector<4xf32> to vector<4x1xf32>
    %53 = arith.addf %39, %52 : vector<4x1xf32>
    %c0_52 = arith.constant 0 : index
    %c1_53 = arith.constant 1 : index
    %c0_54 = arith.constant 0 : index
    %c0_55 = arith.constant 0 : index
    %54 = vector.load %arg4[%c0_52, %c1_53, %c0_54, %c0_55] : memref<1x4x4x256xf32, #tpu.memory_space<vmem>>, vector<1x1x4x256xf32>
    %55 = vector.shape_cast %54 : vector<1x1x4x256xf32> to vector<4x256xf32>
    %56 = vector.shape_cast %46 : vector<4x256xf32> to vector<1x1x4x256xf32>
    tpu.vector_store %arg4[%c0_52, %c1_53, %c0_54, %c0_55], %56 {strides = array<i32>} : memref<1x4x4x256xf32, #tpu.memory_space<vmem>>, vector<1x1x4x256xf32>,
    %57 = tpu.concatenate %14, %11, %23, %20 in 0 : vector<4x256xf32>, vector<4x256xf32>, vector<4x256xf32>, vector<4x256xf32> -> vector<16x256xf32>
    %c1_56 = arith.constant 1 : index
    %c0_57 = arith.constant 0 : index
    %c0_58 = arith.constant 0 : index
    %c0_59 = arith.constant 0 : index
    %58 = vector.load %arg3[%c1_56, %c0_57, %c0_58, %c0_59] : memref<2x2x4x16xf32, #tpu.memory_space<vmem>>, vector<1x1x4x16xf32>
    %59 = vector.shape_cast %58 : vector<1x1x4x16xf32> to vector<4x16xf32>
    %cst_60 = arith.constant dense<0.000000e+00> : vector<4x256xf32>
    %60 = tpu.matmul %59, %57, %cst_60 {dimension_numbers = #tpu.dot_dimension_numbers<[1], [0], [0], [1], [0, 0, 1, 1], [], []>} : vector<4x16xf32>, vector<16x256xf32>, vector<4x256xf32> -> vector<4x256xf32>
    %cst_61 = arith.constant dense<0.000000e+00> : vector<4xf32>
    %61 = vector.multi_reduction <add>, %60, %cst_61 [1] : vector<4x256xf32> to vector<4xf32>
    %62 = vector.shape_cast %61 : vector<4xf32> to vector<4x1xf32>
    %63 = arith.addf %49, %62 : vector<4x1xf32>
    %64 = arith.mulf %60, %60 : vector<4x256xf32>
    %cst_62 = arith.constant dense<0.000000e+00> : vector<4xf32>
    %65 = vector.multi_reduction <add>, %64, %cst_62 [1] : vector<4x256xf32> to vector<4xf32>
    %66 = vector.shape_cast %65 : vector<4xf32> to vector<4x1xf32>
    %67 = arith.addf %53, %66 : vector<4x1xf32>
    %c0_63 = arith.constant 0 : index
    %c2_64 = arith.constant 2 : index
    %c0_65 = arith.constant 0 : index
    %c0_66 = arith.constant 0 : index
    %68 = vector.load %arg4[%c0_63, %c2_64, %c0_65, %c0_66] : memref<1x4x4x256xf32, #tpu.memory_space<vmem>>, vector<1x1x4x256xf32>
    %69 = vector.shape_cast %68 : vector<1x1x4x256xf32> to vector<4x256xf32>
    %70 = vector.shape_cast %60 : vector<4x256xf32> to vector<1x1x4x256xf32>
    tpu.vector_store %arg4[%c0_63, %c2_64, %c0_65, %c0_66], %70 {strides = array<i32>} : memref<1x4x4x256xf32, #tpu.memory_space<vmem>>, vector<1x1x4x256xf32>,
    %71 = tpu.concatenate %14, %17, %23, %26 in 0 : vector<4x256xf32>, vector<4x256xf32>, vector<4x256xf32>, vector<4x256xf32> -> vector<16x256xf32>
    %c1_67 = arith.constant 1 : index
    %c1_68 = arith.constant 1 : index
    %c0_69 = arith.constant 0 : index
    %c0_70 = arith.constant 0 : index
    %72 = vector.load %arg3[%c1_67, %c1_68, %c0_69, %c0_70] : memref<2x2x4x16xf32, #tpu.memory_space<vmem>>, vector<1x1x4x16xf32>
    %73 = vector.shape_cast %72 : vector<1x1x4x16xf32> to vector<4x16xf32>
    %cst_71 = arith.constant dense<0.000000e+00> : vector<4x256xf32>
    %74 = tpu.matmul %73, %71, %cst_71 {dimension_numbers = #tpu.dot_dimension_numbers<[1], [0], [0], [1], [0, 0, 1, 1], [], []>} : vector<4x16xf32>, vector<16x256xf32>, vector<4x256xf32> -> vector<4x256xf32>
    %cst_72 = arith.constant dense<0.000000e+00> : vector<4xf32>
    %75 = vector.multi_reduction <add>, %74, %cst_72 [1] : vector<4x256xf32> to vector<4xf32>
    %76 = vector.shape_cast %75 : vector<4xf32> to vector<4x1xf32>
    %77 = arith.addf %63, %76 : vector<4x1xf32>
    %78 = arith.mulf %74, %74 : vector<4x256xf32>
    %cst_73 = arith.constant dense<0.000000e+00> : vector<4xf32>
    %79 = vector.multi_reduction <add>, %78, %cst_73 [1] : vector<4x256xf32> to vector<4xf32>
    %80 = vector.shape_cast %79 : vector<4xf32> to vector<4x1xf32>
    %81 = arith.addf %67, %80 : vector<4x1xf32>
    %c0_74 = arith.constant 0 : index
    %c3 = arith.constant 3 : index
    %c0_75 = arith.constant 0 : index
    %c0_76 = arith.constant 0 : index
    %82 = vector.load %arg4[%c0_74, %c3, %c0_75, %c0_76] : memref<1x4x4x256xf32, #tpu.memory_space<vmem>>, vector<1x1x4x256xf32>
    %83 = vector.shape_cast %82 : vector<1x1x4x256xf32> to vector<4x256xf32>
    %84 = vector.shape_cast %74 : vector<4x256xf32> to vector<1x1x4x256xf32>
    tpu.vector_store %arg4[%c0_74, %c3, %c0_75, %c0_76], %84 {strides = array<i32>} : memref<1x4x4x256xf32, #tpu.memory_space<vmem>>, vector<1x1x4x256xf32>,
    %85 = tpu.concatenate %77, %81 in 1 : vector<4x1xf32>, vector<4x1xf32> -> vector<4x2xf32>
    %c0_77 = arith.constant 0 : index
    %c0_78 = arith.constant 0 : index
    %c0_79 = arith.constant 0 : index
    %86 = vector.load %arg5[%c0_77, %c0_78, %c0_79] : memref<1x4x2xf32, #tpu.memory_space<vmem>>, vector<1x4x2xf32>
    %87 = vector.shape_cast %86 : vector<1x4x2xf32> to vector<4x2xf32>
    %88 = vector.shape_cast %85 : vector<4x2xf32> to vector<1x4x2xf32>
    tpu.vector_store %arg5[%c0_77, %c0_78, %c0_79], %88 {strides = array<i32>} : memref<1x4x2xf32, #tpu.memory_space<vmem>>, vector<1x4x2xf32>,
    return
  }
  func.func @transform_0(%arg0: i32, %arg1: i32) -> (i32, i32, i32, i32) {
    %c0_i32 = arith.constant 0 : i32
    %c0_i32_0 = arith.constant 0 : i32
    %c0_i32_1 = arith.constant 0 : i32
    %c0_i32_2 = arith.constant 0 : i32
    return %arg1, %c0_i32, %c0_i32_0, %c0_i32_1 : i32, i32, i32, i32
  }
  func.func @transform_1(%arg0: i32, %arg1: i32) -> (i32, i32, i32, i32) {
    %c0_i32 = arith.constant 0 : i32
    %c0_i32_0 = arith.constant 0 : i32
    %c0_i32_1 = arith.constant 0 : i32
    %c0_i32_2 = arith.constant 0 : i32
    return %c0_i32, %c0_i32_0, %arg0, %c0_i32_1 : i32, i32, i32, i32
  }
  func.func @transform_2(%arg0: i32, %arg1: i32) -> (i32, i32, i32, i32) {
    %c0_i32 = arith.constant 0 : i32
    %c0_i32_0 = arith.constant 0 : i32
    %c0_i32_1 = arith.constant 0 : i32
    return %arg1, %c0_i32, %arg0, %c0_i32_0 : i32, i32, i32, i32
  }
  func.func @transform_3(%arg0: i32, %arg1: i32) -> (i32, i32, i32) {
    %c0_i32 = arith.constant 0 : i32
    %c0_i32_0 = arith.constant 0 : i32
    return %arg1, %arg0, %c0_i32 : i32, i32, i32
  }
}

</mosaic_0001>

<bundles_post_ra>
// kernel: tpu_custom_call.1
= control target key start
LH: loop header
LB: loop body
LE: loop exit
PB: predicated region body
PF: predicated region fallthrough
CT: control target
= control target key end

     0   :  { %9 = vsyncpa [#allocation3], 0  ;;  %s4779_s0 = inlined_call_operand.vmem [shape: f32[2,4,18,18], index: 0, kind: input, shape index: {}]   ;;  %s4780_s1 = inlined_call_operand.vmem [shape: f32[2,2,4,16], index: 1, kind: input, shape index: {}]   ;;  %s4781_s2 = inlined_call_operand.hbm [shape: f32[2,4,4,256], index: 2, kind: output, shape index: {0}]   ;;  %s4782_s3 = inlined_call_operand.vmem [shape: f32[2,4,2], index: 3, kind: output, shape index: {1}]  }
   0x1   :  { %11 = vsyncpa [#allocation3 + $0x1], 0  ;;  %s3084_s12 = smov 0   ;;  %s3086_s13 = smov 0  }
   0x2   :  { %s3088_s14 = smov 0   ;;  %s3090_s15 = smov 0  }
   0x3   :  { %s3092_s16 = smov 0   ;;  %s3094_s17 = smov 0  }
   0x4 LB: > { %s2852_s18 = sadd.s32 4294967295, %s3047_s17   ;;  %s2853_s19 = sadd.s32 4294967294, %s3047_s17   ;;  %s3047_s17 = sphi %s3094_s17, %s17_s17   ;;  %s3043_s16 = sphi %s3092_s16, %s4922_s16   ;;  %s3039_s15 = sphi %s3090_s15, %s4921_s15   ;;  %s3035_s14 = sphi %s3088_s14, %s4920_s14   ;;  %s3031_s13 = sphi %s3086_s13, %s4919_s13   ;;  %s3027_s12 = sphi %s3084_s12, %s4918_s12  }
   0x5   : > { %s26_s20 = sadd.s32 1, %s3043_s16  ;;  %s90_s21 = sadd.s32 1, %s3035_s14 }
   0x6   : > { %p27_p0 = scmp.ge.s32.totalorder %s26_s20, 2  ;;  %p100_p1 = scmp.ne.s32.totalorder %s3035_s14, %s3031_s13 }
   0x7   : > { %p101_p2 = scmp.eq.s32.totalorder %s2852_s18, 1  ;;  %p106_p3 = scmp.ne.s32.totalorder %s3031_s13, %s3027_s12 }
   0x8   : > { %s4924_s20 = smov (%p27_p0, %s26_s20), 0  ;;  %p107_p5 = scmp.eq.s32.totalorder %s2853_s19, 1 }
   0x9   : > { %p3124_p4 = por %p101_p2, %p100_p1  ;;  %s85_s23 = ssub.s32 %s3043_s16, %s4924_s20 }
   0xa   : > { %p2857_p6 = scmp.ge.s32.totalorder %s3047_s17, 1  ;;  %p88_p7 = scmp.eq.s32.totalorder %s85_s23, 0 }
   0xb   : > { %p3131_p8 = por %p107_p5, %p106_p3  ;;  %p168_p9 = scmp.lt.s32.totalorder %s3047_s17, 3 }
   0xc   : > { %s3137_s25 = scalar_select %p88_p7, %s3035_s14, %s90_s21  }
   0xd   : > { %p169_p10 = pnand %p2857_p6, %p168_p9 }
   0xf   : > { %172 = sbr.rel (%p169_p10) target bundleno = 861 (0x35d), region = 28 }
  0x14   : > { %p203_p11 = scmp.lt.s32.totalorder %s3039_s15, 1  ;;  %v3049_v0 = vmov 1983009808   ;;  %v232_v2 = vlaneseq  ;;  %v4785_v3 = vmov 0.0   ;;  %s3051_s4 = smov 127   ;;  %vm419_vm0 = vcmask 130048  }
  0x15   : > { %v230_v1 = vunpack.c.l.s4 %v3049_v0  ;;  %2357 = vmatprep.mubr.f32.mxu0 %v4785_v3  ;;  %2468 = vmatprep.mubr.f32.mxu1 %v4785_v3  ;;  %s3052_s5 = smov 126   ;;  %v3053_v58 = vmov 1934713408   ;;  %s3054_s6 = smov 16   ;;  %vm421_vm1 = vcmask 261120   ;;  %vm423_vm2 = vcmask 392192  }
  0x16   : > { %s3141_s26 = scalar_select %p203_p11, %s3039_s15, 1  ;;  %v3151_v5 = vshrl.u32 %v232_v2, 7  ;;  %v262_v59 = vunpack.c.l.s4 %v3053_v58  ;;  %vm425_vm3 = vcmask 523264   ;;  %vm427_vm4 = vcmask 654336  }
  0x17   : > { %v231_v4 = vunpack.c.0.s8 %v230_v1  ;;  %s3055_s7 = smov 32   ;;  %s3056_s8 = smov 48   ;;  %vm429_vm5 = vcmask 785408   ;;  %vm431_vm6 = vcmask 916480   ;;  %vm2284_vm7 = vcmask 1043456  }
  0x18   : > { %s2877_s27 = smul.u32 96, %s3141_s26  ;;  %v263_v62 = vunpack.c.0.s8 %v262_v59  ;;  %s3057_s9 = smov 64  }
  0x19   : > { %v3164_v18 = vsub.s32 %v231_v4, %v3151_v5  ;;  %s3058_s10 = smov 80   ;;  %s3059_s11 = smov 96  }
  0x1a   : > { %s3149_s30 = scalar_lea.vmem %s4779_s0, %s2877_s27  ;;  %s3060_s18 = smov 112  }
  0x1b   : > { %v224_v6 = vld [vmem:[%s3149_s30 + $0x38] sm:$0xff]  ;;  %v220_v7 = vld [vmem:[%s3149_s30 + $0x8] sm:$0xff]  ;;  %v226_v8 = vld [vmem:[%s3149_s30 + $0x50] sm:$0xff]  ;;  %s3061_s23 = smov [#allocation2]  }
  0x1c   : > { %458 = vrot.lane.b32.xlu1 %v224_v6, %s3051_s4  ;;  %450 = vrot.lane.b32.xlu0 %v220_v7, %s3051_s4  ;;  %v295_v9 = vcombine.low %v220_v7, %v224_v6  ;;  %v296_v10 = vcombine.high %v220_v7, %v224_v6  ;;  %v222_v11 = vld [vmem:[%s3149_s30 + $0x20] sm:$0xff]  ;;  %v221_v12 = vld [vmem:[%s3149_s30 + $0x18] sm:$0xff]  ;;  %s2975_s27 = sshll.u32 %s3061_s23, 4  ;;  %s2976_s27 = int_to_ptr.vmem [resolvable:$false] %s2975_s27 }
  0x1d   : > { %v311_v13 = vcombine.low %v222_v11, %v226_v8  ;;  %v312_v14 = vcombine.high %v222_v11, %v226_v8  ;;  %v219_v15 = vld [vmem:[%s3149_s30] sm:$0xff]  ;;  %v225_v16 = vld [vmem:[%s3149_s30 + $0x48] sm:$0xff]  ;;  %v223_v17 = vld [vmem:[%s3149_s30 + $0x30] sm:$0xff]  ;;  %s2977_s28 = scalar_lea.vmem %s2976_s27, 1024 }
  0x1e   : > { %v243_v19 = vcombine.low %v221_v12, %v225_v16  ;;  %v244_v20 = vcombine.high %v221_v12, %v225_v16  ;;  %v227_v21 = vcombine.low %v219_v15, %v223_v17  ;;  %v3167_v22 = vld [vmem:[%s3149_s30 + $0x21] sm:$0xff]  ;;  %v3170_v23 = vld [vmem:[%s3149_s30 + $0x51] sm:$0xff]  ;;  %v228_v24 = vcombine.high %v219_v15, %v223_v17  ;;  %v3173_v25 = vld [vmem:[%s3149_s30 + $0x9] sm:$0xff] }
  0x1f   : > { %v1001_v26 = vcombine.high %v3167_v22, %v3170_v23  ;;  %v3178_v27 = vld [vmem:[%s3149_s30 + $0x39] sm:$0xff]  ;;  %v3186_v29 = vld [vmem:[%s3149_s30 + $0x49] sm:$0xff]  ;;  %v3191_v31 = vld [vmem:[%s3149_s30 + $0x1] sm:$0xff]  ;;  %v3207_v37 = vrot.slane %v295_v9, %v3164_v18  ;;  %v3210_v38 = vrot.slane %v311_v13, %v3164_v18  ;;  %v3225_v43 = vrot.slane %v296_v10, %v3164_v18 }
  0x20   : > { %462 = vrot.lane.b32.xlu1 %v226_v8, %s3051_s4  ;;  %454 = vrot.lane.b32.xlu0 %v222_v11, %s3051_s4  ;;  %v3183_v28 = vld [vmem:[%s3149_s30 + $0x19] sm:$0xff]  ;;  %v985_v30 = vcombine.high %v3173_v25, %v3178_v27  ;;  %v3196_v33 = vld [vmem:[%s3149_s30 + $0x31] sm:$0xff]  ;;  %v3199_v34 = vrot.slane %v243_v19, %v3164_v18  ;;  %v3202_v35 = vrot.slane %v227_v21, %v3164_v18 }
  0x21   : > { %v933_v32 = vcombine.high %v3183_v28, %v3186_v29  ;;  %v917_v36 = vcombine.high %v3191_v31, %v3196_v33  ;;  %v327_v40 = vcombine.low %v3207_v37, %v3210_v38  ;;  %v328_v42 = vcombine.high %v3207_v37, %v3210_v38  ;;  %v3291_v53 = vld [vmem:[%s3149_s30 + $0x22] sm:$0xff]  ;;  %v3294_v54 = vld [vmem:[%s3149_s30 + $0xa] sm:$0xff]  ;;  %v3301_v55 = vld [vmem:[%s3149_s30 + $0x52] sm:$0xff] }
  0x22   : > { %v259_v39 = vcombine.low %v3202_v35, %v3199_v34  ;;  %v260_v41 = vcombine.high %v3202_v35, %v3199_v34  ;;  %v3228_v44 = vrot.slane %v312_v14, %v3164_v18  ;;  %v3235_v46 = vrot.slane %v228_v24, %v3164_v18  ;;  %4819 = vst [vmem:[#allocation5_spill] sm:$0xff] %v3294_v54  ;;  %v3304_v56 = vld [vmem:[%s3149_s30 + $0x3a] sm:$0xff]  ;;  %v3324_v61 = vld [vmem:[%s3149_s30 + $0x2] sm:$0xff]  ;;  %v3343_v1 = vld [vmem:[%s3149_s30 + $0x4a] sm:$0xff] }
  0x23   : > { %v3238_v47 = vrot.slane %v244_v20, %v3164_v18  ;;  %v3275_v50 = vrot.slane %v985_v30, %v3164_v18  ;;  %v3278_v51 = vrot.slane %v1001_v26, %v3164_v18  ;;  %v3321_v60 = vld [vmem:[%s3149_s30 + $0x1a] sm:$0xff]  ;;  %4821 = vst [vmem:[#allocation7_spill] sm:$0xff] %v3324_v61  ;;  %v3334_v63 = vrot.slane %v917_v36, %v3164_v18  ;;  %v3346_v2 = vld [vmem:[%s3149_s30 + $0x32] sm:$0xff] }
  0x24   : > { %684 = vrot.lane.b32.xlu1 %v222_v11, %s3052_s5  ;;  %680 = vrot.lane.b32.xlu0 %v220_v7, %s3052_s5  ;;  %v343_v45 = vcombine.low %v3225_v43, %v3228_v44  ;;  %4820 = vst [vmem:[#allocation6_spill] sm:$0xff] %v3321_v60  ;;  %v3340_v0 = vrot.slane %v933_v32, %v3164_v18  ;;  %4822 = vst [vmem:[#allocation8_spill] sm:$0xff] %v3343_v1 }
  0x25   : > { %v275_v48 = vcombine.low %v3235_v46, %v3238_v47  ;;  %4823 = vst [vmem:[#allocation9_spill] sm:$0xff] %v3346_v2  ;;  %v984_v7 = vcombine.low %v3173_v25, %v3178_v27  ;;  %v916_v13 = vcombine.low %v3191_v31, %v3196_v33 }
  0x27   : > { %v992_v10 = vrot.slane %v984_v7, %v3164_v18  ;;  %v3395_v19 = vrot.slane %v916_v13, %v3164_v18 }
  0x28   : > { %692 = vrot.lane.b32.xlu1 %v226_v8, %s3052_s5  ;;  %688 = vrot.lane.b32.xlu0 %v224_v6, %s3052_s5  ;;  %v1000_v6 = vcombine.low %v3167_v22, %v3170_v23  ;;  %v3359_v8 = vsub.s32 %v263_v62, %v3151_v5 }
  0x2a   : > { %v1008_v9 = vrot.slane %v1000_v6, %v3164_v18  ;;  %v3371_v11 = vrot.slane %v259_v39, %v3359_v8  ;;  %v3377_v5 = vrot.slane %v327_v40, %v3359_v8  ;;  %v274_v20 = vrot.slane %v260_v41, %v3359_v8 }
  0x2b   : > { %v342_v21 = vrot.slane %v328_v42, %v3359_v8 }
  0x2c   : > { %452 = vrot.lane.b32.xlu1 %v221_v12, %s3051_s4  ;;  %448 = vrot.lane.b32.xlu0 %v219_v15, %s3051_s4  ;;  %4824 = vst [vmem:[#allocation10_spill] sm:$0xff] %v3371_v11  ;;  %4825 = vst [vmem:[#allocation11_spill] sm:$0xff] %v3377_v5  ;;  %v291_v14 = vcombine.high %v3371_v11, %v4785_v3  ;;  %v1017_v26 = vcombine.high %v992_v10, %v1008_v9 }
  0x2d   : > { %v360_v24 = vcombine.high %v342_v21, %v4785_v3 }
  0x2e   : > { %v3430_v30 = vrot.slane %v1017_v26, %v3359_v8 }
  0x30   : > { %460 = vrot.lane.b32.xlu1 %v225_v16, %s3051_s4  ;;  %456 = vrot.lane.b32.xlu0 %v223_v17, %s3051_s4 }
  0x34   : > { %682 = vrot.lane.b32.xlu1 %v221_v12, %s3052_s5  ;;  %678 = vrot.lane.b32.xlu0 %v219_v15, %s3052_s5  ;;  %v932_v12 = vcombine.low %v3183_v28, %v3186_v29  ;;  %v359_v15 = vcombine.high %v3377_v5, %v4785_v3 }
  0x38   : > { %690 = vrot.lane.b32.xlu1 %v225_v16, %s3052_s5  ;;  %686 = vrot.lane.b32.xlu0 %v223_v17, %s3052_s5  ;;  %v1016_v16 = vcombine.low %v992_v10, %v1008_v9  ;;  %v3392_v17 = vrot.slane %v932_v12, %v3164_v18 }
  0x3c   : > { %1136 = vrot.lane.b32.xlu1 %v3167_v22, %s3051_s4  ;;  %1132 = vrot.lane.b32.xlu0 %v3173_v25, %s3051_s4 }
  0x40   : > { %1144 = vrot.lane.b32.xlu1 %v3170_v23, %s3051_s4  ;;  %1140 = vrot.lane.b32.xlu0 %v3178_v27, %s3051_s4 }
  0x44   : > { %1366 = vrot.lane.b32.xlu1 %v3167_v22, %s3052_s5  ;;  %1362 = vrot.lane.b32.xlu0 %v3173_v25, %s3052_s5  ;;  %v3408_v22 = vrot.slane %v1016_v16, %v3359_v8  ;;  %v948_v25 = vcombine.low %v3395_v19, %v3392_v17 }
  0x46   : > { %4826 = vst [vmem:[#allocation12_spill] sm:$0xff] %v3408_v22 }
  0x48   : > { %1374 = vrot.lane.b32.xlu1 %v3170_v23, %s3052_s5  ;;  %1370 = vrot.lane.b32.xlu0 %v3178_v27, %s3052_s5  ;;  %v1048_v23 = vcombine.high %v3408_v22, %v4785_v3  ;;  %v351_v27 = vrot.slane %v343_v45, %v3359_v8 }
  0x4a   : > { %v361_v32 = vcombine.high %v351_v27, %v4785_v3 }
  0x4c   : > { %1134 = vrot.lane.b32.xlu1 %v3183_v28, %s3051_s4  ;;  %1130 = vrot.lane.b32.xlu0 %v3191_v31, %s3051_s4 }
  0x50   : > { %1142 = vrot.lane.b32.xlu1 %v3186_v29, %s3051_s4  ;;  %1138 = vrot.lane.b32.xlu0 %v3196_v33, %s3051_s4 }
  0x54   : > { %1364 = vrot.lane.b32.xlu1 %v3183_v28, %s3052_s5  ;;  %1360 = vrot.lane.b32.xlu0 %v3191_v31, %s3052_s5  ;;  %v292_v28 = vcombine.high %v274_v20, %v4785_v3 }
  0x58   : > { %1372 = vrot.lane.b32.xlu1 %v3186_v29, %s3052_s5  ;;  %1368 = vrot.lane.b32.xlu0 %v3196_v33, %s3052_s5  ;;  %v3425_v29 = vrot.slane %v948_v25, %v3359_v8  ;;  %v3442_v33 = vrot.slane %v275_v48, %v3359_v8 }
  0x5a   : > { %4827 = vst [vmem:[#allocation13_spill] sm:$0xff] %v3425_v29  ;;  %v980_v31 = vcombine.high %v3425_v29, %v4785_v3 }
  0x5c   : > { %1818 = vrot.lane.b32.xlu1 %v3291_v53, %s3051_s4  ;;  %1814 = vrot.lane.b32.xlu0 %v3294_v54, %s3051_s4 }
  0x60   : > { %1826 = vrot.lane.b32.xlu1 %v3301_v55, %s3051_s4  ;;  %1822 = vrot.lane.b32.xlu0 %v3304_v56, %s3051_s4 }
  0x64   : > { %2048 = vrot.lane.b32.xlu1 %v3291_v53, %s3052_s5  ;;  %2044 = vrot.lane.b32.xlu0 %v3294_v54, %s3052_s5 }
  0x68   : > { %2056 = vrot.lane.b32.xlu1 %v3301_v55, %s3052_s5  ;;  %2052 = vrot.lane.b32.xlu0 %v3304_v56, %s3052_s5 }
  0x6c   : > { %1816 = vrot.lane.b32.xlu1 %v3321_v60, %s3051_s4  ;;  %1812 = vrot.lane.b32.xlu0 %v3324_v61, %s3051_s4 }
  0x70   : > { %1824 = vrot.lane.b32.xlu1 %v3343_v1, %s3051_s4  ;;  %1820 = vrot.lane.b32.xlu0 %v3346_v2, %s3051_s4 }
  0x74   : > { %2046 = vrot.lane.b32.xlu1 %v3321_v60, %s3052_s5  ;;  %2042 = vrot.lane.b32.xlu0 %v3324_v61, %s3052_s5 }
  0x78   : > { %2054 = vrot.lane.b32.xlu1 %v3343_v1, %s3052_s5  ;;  %2050 = vrot.lane.b32.xlu0 %v3346_v2, %s3052_s5  ;;  %s191_s5 = sand.u32 1, %s3031_s13  }
  0x79   : > { %s4730_s19 = scalar_lea.sflag [#allocation3], %s191_s5 }
  0x7c   : > { %364 = vrot.lane.b32.xlu1 %v291_v14, %s3054_s6  ;;  %392 = vrot.lane.b32.xlu0 %v359_v15, %s3054_s6 }
  0x80   : > { %368 = vrot.lane.b32.xlu1 %v274_v20, %s3055_s7  ;;  %396 = vrot.lane.b32.xlu0 %v342_v21, %s3055_s7 }
  0x84   : > { %1081 = vrot.lane.b32.xlu1 %v1048_v23, %s3054_s6  ;;  %400 = vrot.lane.b32.xlu0 %v360_v24, %s3056_s8 }
  0x88   : > { %404 = vrot.lane.b32.xlu1 %v351_v27, %s3057_s9  ;;  %372 = vrot.lane.b32.xlu0 %v292_v28, %s3056_s8 }
  0x8c   : > { %1085 = vrot.lane.b32.xlu1 %v3430_v30, %s3055_s7  ;;  %1053 = vrot.lane.b32.xlu0 %v980_v31, %s3054_s6 }
  0x8e   : > { %v3444_v34 = vpop.permute.xlu1 %458  ;;  %v3446_v35 = vpop.permute.xlu0 %450 }
  0x8f   : > { %v540_v37 = vcombine.low %v3446_v35, %v3444_v34 }
  0x90   : > { %408 = vrot.lane.b32.xlu1 %v361_v32, %s3058_s10  ;;  %376 = vrot.lane.b32.xlu0 %v3442_v33, %s3057_s9 }
  0x91   : > { %v548_v41 = vrot.slane %v540_v37, %v3164_v18 }
  0x92   : > { %v3455_v38 = vpop.permute.xlu1 %462  ;;  %v3457_v39 = vpop.permute.xlu0 %454 }
  0x93   : > { %v556_v40 = vcombine.low %v3457_v39, %v3455_v38 }
  0x95   : > { %v564_v42 = vrot.slane %v556_v40, %v3164_v18 }
  0x96   : > { %v3463_v45 = vpop.permute.xlu1 %684  ;;  %v3465_v48 = vpop.permute.xlu0 %680 }
  0x97   : > { %v573_v58 = vcombine.high %v548_v41, %v564_v42  ;;  %v572_v10 = vcombine.low %v548_v41, %v564_v42 }
  0x99   : > { %v587_v59 = vrot.slane %v573_v58, %v3359_v8  ;;  %v3485_v21 = vrot.slane %v572_v10, %v3359_v8 }
  0x9a   : > { %v3468_v62 = vpop.permute.xlu1 %692  ;;  %v3470_v6 = vpop.permute.xlu0 %688 }
  0x9b   : > { %v786_v7 = vcombine.low %v3463_v45, %v3468_v62  ;;  %v770_v9 = vcombine.low %v3465_v48, %v3470_v6  ;;  %641 = vrot.lane.b32.xlu1 %v587_v59, %s3055_s7  ;;  %4828 = vst [vmem:[#allocation14_spill] sm:$0xff] %v3485_v21  ;;  %v604_v32 = vcombine.high %v3485_v21, %v4785_v3 }
  0x9d   : > { %v794_v12 = vrot.slane %v786_v7, %v3164_v18  ;;  %v778_v13 = vrot.slane %v770_v9, %v3164_v18 }
  0x9e   : > { %v3479_v14 = vpop.permute.xlu1 %452  ;;  %v3481_v15 = vpop.permute.xlu0 %448 }
  0x9f   : > { %v803_v16 = vcombine.high %v778_v13, %v794_v12  ;;  %v802_v27 = vcombine.low %v778_v13, %v794_v12  ;;  %v605_v12 = vcombine.high %v587_v59, %v4785_v3 }
  0xa1   : > { %v817_v20 = vrot.slane %v803_v16, %v3359_v8  ;;  %v3509_v7 = vrot.slane %v802_v27, %v3359_v8 }
  0xa2   : > { %v3487_v23 = vpop.permute.xlu1 %460  ;;  %v3489_v24 = vpop.permute.xlu0 %456 }
  0xa3   : > { %v488_v25 = vcombine.low %v3479_v14, %v3487_v23  ;;  %v472_v26 = vcombine.low %v3481_v15, %v3489_v24  ;;  %871 = vrot.lane.b32.xlu1 %v817_v20, %s3055_s7  ;;  %4829 = vst [vmem:[#allocation15_spill] sm:$0xff] %v3509_v7  ;;  %v834_v27 = vcombine.high %v3509_v7, %v4785_v3 }
  0xa5   : > { %v496_v28 = vrot.slane %v488_v25, %v3164_v18  ;;  %v480_v31 = vrot.slane %v472_v26, %v3164_v18 }
  0xa6   : > { %v3500_v37 = vpop.permute.xlu1 %682  ;;  %v3502_v40 = vpop.permute.xlu0 %678 }
  0xa7   : > { %637 = vrot.lane.b32.xlu1 %v604_v32, %s3054_s6  ;;  %v505_v41 = vcombine.high %v480_v31, %v496_v28  ;;  %v504_v42 = vcombine.low %v480_v31, %v496_v28  ;;  %v835_v32 = vcombine.high %v817_v20, %v4785_v3 }
  0xa9   : > { %v3506_v58 = vrot.slane %v505_v41, %v3359_v8  ;;  %v3528_v59 = vrot.slane %v504_v42, %v3359_v8  ;;  %v1682_v41 = vcombine.low %v3291_v53, %v3301_v55 }
  0xaa   : > { %v3511_v9 = vpop.permute.xlu1 %690  ;;  %v3513_v10 = vpop.permute.xlu0 %686 }
  0xab   : > { %v718_v13 = vcombine.low %v3500_v37, %v3511_v9  ;;  %v702_v16 = vcombine.low %v3502_v40, %v3513_v10  ;;  %613 = vrot.lane.b32.xlu0 %v3506_v58, %s3055_s7  ;;  %645 = vrot.lane.b32.xlu1 %v605_v12, %s3056_s8  ;;  %4830 = vst [vmem:[#allocation16_spill] sm:$0xff] %v3528_v59 }
  0xac   : > { %v536_v42 = vcombine.high %v3528_v59, %v4785_v3  ;;  %v3573_v7 = vrot.slane %v1682_v41, %v3164_v18 }
  0xad   : > { %v726_v25 = vrot.slane %v718_v13, %v3164_v18  ;;  %v710_v26 = vrot.slane %v702_v16, %v3164_v18  ;;  %v1049_v13 = vcombine.high %v3430_v30, %v4785_v3 }
  0xae   : > { %v3530_v28 = vpop.permute.xlu1 %1136  ;;  %v3532_v31 = vpop.permute.xlu0 %1132 }
  0xaf   : > { %v734_v12 = vcombine.low %v710_v26, %v726_v25  ;;  %867 = vrot.lane.b32.xlu0 %v834_v27, %s3054_s6  ;;  %875 = vrot.lane.b32.xlu1 %v835_v32, %s3056_s8  ;;  %v1666_v27 = vcombine.low %v3294_v54, %v3304_v56  ;;  %v735_v52 = vcombine.high %v710_v26, %v726_v25 }
  0xb0   : > { %v541_v54 = vcombine.high %v3446_v35, %v3444_v34 }
  0xb1   : > { %v3544_v16 = vrot.slane %v734_v12, %v3359_v8  ;;  %v749_v25 = vrot.slane %v735_v52, %v3359_v8 }
  0xb2   : > { %v3546_v36 = vpop.permute.xlu1 %1144  ;;  %v3548_v20 = vpop.permute.xlu0 %1140 }
  0xb3   : > { %4831 = vst [vmem:[#allocation17_spill] sm:$0xff] %v3544_v16  ;;  %v1238_v32 = vcombine.low %v3530_v28, %v3546_v36  ;;  %v1222_v30 = vcombine.low %v3532_v31, %v3548_v20  ;;  %609 = vrot.lane.b32.xlu0 %v536_v42, %s3054_s6  ;;  %1089 = vrot.lane.b32.xlu1 %v1049_v13, %s3056_s8 }
  0xb4   : > { %v766_v57 = vcombine.high %v3544_v16, %v4785_v3  ;;  %v3576_v42 = vrot.slane %v1666_v27, %v3164_v18  ;;  %v949_v13 = vcombine.high %v3395_v19, %v3392_v17 }
  0xb5   : > { %v3561_v12 = vrot.slane %v1238_v32, %v3164_v18  ;;  %v3564_v4 = vrot.slane %v1222_v30, %v3164_v18 }
  0xb6   : > { %v3568_v49 = vpop.permute.xlu1 %1366  ;;  %v3570_v59 = vpop.permute.xlu0 %1362  ;;  %v1698_v17 = vcombine.low %v3576_v42, %v3573_v7 }
  0xb7   : > { %839 = vrot.lane.b32.xlu0 %v766_v57, %s3054_s6  ;;  %v1254_v32 = vcombine.low %v3564_v4, %v3561_v12  ;;  %v963_v57 = vrot.slane %v949_v13, %v3359_v8 }
  0xb8   : > { %v3613_v13 = vrot.slane %v1698_v17, %v3359_v8 }
  0xb9   : > { %v3603_v3 = vrot.slane %v1254_v32, %v3359_v8 }
  0xba   : > { %v3584_v26 = vpop.permute.xlu1 %1374  ;;  %v3586_v30 = vpop.permute.xlu0 %1370  ;;  %4835 = vst [vmem:[#allocation21_spill] sm:$0xff] %v3613_v13 }
  0xbb   : > { %v1468_v41 = vcombine.low %v3568_v49, %v3584_v26  ;;  %v1452_v27 = vcombine.low %v3570_v59, %v3586_v30  ;;  %843 = vrot.lane.b32.xlu0 %v749_v25, %s3055_s7  ;;  %4832 = vst [vmem:[#allocation18_spill] sm:$0xff] %v3603_v3 }
  0xbd   : > { %v3597_v19 = vrot.slane %v1468_v41, %v3164_v18  ;;  %v3600_v52 = vrot.slane %v1452_v27, %v3164_v18  ;;  %v557_v41 = vcombine.high %v3457_v39, %v3455_v38  ;;  %v4836_v27 = vmov 0.0  }
  0xbe   : > { %v3605_v16 = vpop.permute.xlu1 %1134  ;;  %v3607_v21 = vpop.permute.xlu0 %1130  ;;  %v1286_v29 = vcombine.high %v3603_v3, %v4836_v27  ;;  %v1730_v38 = vcombine.high %v3613_v13, %v4836_v27  ;;  %v771_v3 = vcombine.high %v3465_v48, %v3470_v6  ;;  %v3648_v13 = vrot.slane %v541_v54, %v3164_v18 }
  0xbf   : > { %4833 = vst [vmem:[#allocation19_spill] sm:$0xff] %v3605_v16  ;;  %4834 = vst [vmem:[#allocation20_spill] sm:$0xff] %v3607_v21  ;;  %v1484_v5 = vcombine.low %v3600_v52, %v3597_v19  ;;  %1057 = vrot.lane.b32.xlu0 %v963_v57, %s3055_s7  ;;  %v3634_v39 = vrot.slane %v557_v41, %v3164_v18  ;;  %v4841_v48 = vcombine.high %v3225_v43, %v3228_v44 }
  0xc0   : > { %v3665_v54 = vrot.slane %v771_v3, %v3164_v18 }
  0xc1   : > { %v3620_v32 = vrot.slane %v1484_v5, %v3359_v8  ;;  %v787_v5 = vcombine.high %v3463_v45, %v3468_v62  ;;  %v588_v6 = vcombine.low %v3648_v13, %v3634_v39 }
  0xc2   : > { %v3622_v22 = vpop.permute.xlu1 %1142  ;;  %v3624_v11 = vpop.permute.xlu0 %1138 }
  0xc3   : > { %4837 = vst [vmem:[#allocation22_spill] sm:$0xff] %v3620_v32  ;;  %4838 = vst [vmem:[#allocation23_spill] sm:$0xff] %v3624_v11  ;;  %1319 = vrot.lane.b32.xlu0 %v1286_v29, %s3054_s6  ;;  %v1516_v17 = vcombine.high %v3620_v32, %v4836_v27  ;;  %v293_v29 = vcombine.high %v3442_v33, %v4836_v27  ;;  %v1170_v41 = vcombine.low %v3605_v16, %v3622_v22 }
  0xc4   : > { %v1154_v45 = vcombine.low %v3607_v21, %v3624_v11  ;;  %v3659_v33 = vrot.slane %v4841_v48, %v3359_v8  ;;  %v3662_v62 = vrot.slane %v787_v5, %v3164_v18  ;;  %v1614_v5 = vcombine.low %v3321_v60, %v3343_v1 }
  0xc5   : > { %1549 = vrot.lane.b32.xlu1 %v1516_v17, %s3054_s6  ;;  %v537_v17 = vcombine.high %v3506_v58, %v4836_v27  ;;  %v3677_v43 = vrot.slane %v1170_v41, %v3164_v18  ;;  %v3694_v41 = vrot.slane %v588_v6, %v3359_v8  ;;  %v767_v6 = vcombine.high %v749_v25, %v4836_v27 }
  0xc6   : > { %v3643_v34 = vpop.permute.xlu1 %1364  ;;  %v3645_v35 = vpop.permute.xlu0 %1360  ;;  %v3680_v44 = vrot.slane %v1154_v45, %v3164_v18  ;;  %v818_v45 = vcombine.low %v3665_v54, %v3662_v62  ;;  %v4845_v25 = vcombine.low %v3275_v50, %v3278_v51  ;;  %v473_v16 = vcombine.high %v3481_v15, %v3489_v24 }
  0xc7   : > { %4839 = vst [vmem:[#allocation24_spill] sm:$0xff] %v3643_v34  ;;  %4840 = vst [vmem:[#allocation25_spill] sm:$0xff] %v3645_v35  ;;  %1763 = vrot.lane.b32.xlu0 %v1730_v38, %s3054_s6  ;;  %v719_v24 = vcombine.high %v3500_v37, %v3511_v9 }
  0xc8   : > { %v826_v1 = vrot.slane %v818_v45, %v3359_v8 }
  0xc9   : > { %380 = vrot.lane.b32.xlu1 %v293_v29, %s3058_s10  ;;  %v1598_v29 = vcombine.low %v3324_v61, %v3346_v2 }
  0xca   : > { %v3672_v38 = vpop.permute.xlu1 %1372  ;;  %v3674_v32 = vpop.permute.xlu0 %1368 }
  0xcb   : > { %4842 = vst [vmem:[#allocation26_spill] sm:$0xff] %v3672_v38  ;;  %4843 = vst [vmem:[#allocation27_spill] sm:$0xff] %v3674_v32  ;;  %412 = vrot.lane.b32.xlu0 %v3659_v33, %s3059_s11  ;;  %v1400_v3 = vcombine.low %v3643_v34, %v3672_v38  ;;  %v1384_v58 = vcombine.low %v3645_v35, %v3674_v32  ;;  %v1186_v35 = vcombine.low %v3680_v44, %v3677_v43 }
  0xcc   : > { %v3717_v2 = vrot.slane %v1598_v29, %v3164_v18 }
  0xcd   : > { %617 = vrot.lane.b32.xlu1 %v537_v17, %s3056_s8  ;;  %v3705_v60 = vrot.slane %v1400_v3, %v3164_v18  ;;  %v3708_v61 = vrot.slane %v1384_v58, %v3164_v18  ;;  %v3714_v17 = vrot.slane %v1614_v5, %v3164_v18  ;;  %v981_v3 = vcombine.high %v963_v57, %v4836_v27 }
  0xce   : > { %v3698_v48 = vpop.permute.xlu1 %1818  ;;  %v3700_v34 = vpop.permute.xlu0 %1814  ;;  %v1040_v5 = vrot.slane %v4845_v25, %v3359_v8  ;;  %v3734_v29 = vrot.slane %v1186_v35, %v3359_v8  ;;  %v1255_v57 = vcombine.high %v3564_v4, %v3561_v12  ;;  %v1485_v4 = vcombine.high %v3600_v52, %v3597_v19 }
  0xcf   : > { %4844 = vst [vmem:[#allocation28_spill] sm:$0xff] %v3700_v34  ;;  %649 = vrot.lane.b32.xlu0 %v3694_v41, %s3057_s9  ;;  %v1416_v38 = vcombine.low %v3708_v61, %v3705_v60  ;;  %v1630_v45 = vcombine.low %v3717_v2, %v3714_v17 }
  0xd0   : > { %4846 = vst [vmem:[#allocation29_spill] sm:$0xff] %v3734_v29  ;;  %v1218_v21 = vcombine.high %v3734_v29, %v4836_v27  ;;  %v1699_v29 = vcombine.high %v3576_v42, %v3573_v7  ;;  %v1499_v19 = vrot.slane %v1485_v4, %v3359_v8  ;;  %v703_v42 = vcombine.high %v3502_v40, %v3513_v10 }
  0xd1   : > { %847 = vrot.lane.b32.xlu1 %v767_v6, %s3056_s8  ;;  %v3747_v25 = vrot.slane %v1416_v38, %v3359_v8  ;;  %v3756_v12 = vrot.slane %v1630_v45, %v3359_v8  ;;  %v489_v38 = vcombine.high %v3479_v14, %v3487_v23  ;;  %v3782_v23 = vrot.slane %v473_v16, %v3164_v18 }
  0xd2   : > { %v3722_v32 = vpop.permute.xlu1 %1826  ;;  %v3724_v58 = vpop.permute.xlu0 %1822  ;;  %v1713_v7 = vrot.slane %v1699_v29, %v3359_v8  ;;  %v4850_v29 = vcombine.high %v3235_v46, %v3238_v47  ;;  %v3797_v16 = vrot.slane %v719_v24, %v3164_v18  ;;  %v362_v40 = vcombine.high %v3659_v33, %v4836_v27 }
  0xd3   : > { %879 = vrot.lane.b32.xlu0 %v826_v1, %s3057_s9  ;;  %4847 = vst [vmem:[#allocation30_spill] sm:$0xff] %v3747_v25  ;;  %4849 = vst [vmem:[#allocation32_spill] sm:$0xff] %v3756_v12  ;;  %v1662_v52 = vcombine.high %v3756_v12, %v4836_v27  ;;  %v3779_v15 = vrot.slane %v489_v38, %v3164_v18  ;;  %v3800_v38 = vrot.slane %v703_v42, %v3164_v18 }
  0xd4   : > { %v290_v45 = vrot.slane %v4850_v29, %v3359_v8  ;;  %v606_v33 = vcombine.high %v3694_v41, %v4836_v27  ;;  %v836_v24 = vcombine.high %v826_v1, %v4836_v27  ;;  %v4851_v29 = vcombine.low %v3334_v63, %v3340_v0 }
  0xd5   : > { %1061 = vrot.lane.b32.xlu1 %v981_v3, %s3056_s8  ;;  %v1269_v3 = vrot.slane %v1255_v57, %v3359_v8  ;;  %v520_v9 = vcombine.low %v3782_v23, %v3779_v15  ;;  %v750_v10 = vcombine.low %v3800_v38, %v3797_v16  ;;  %v1904_v41 = vcombine.low %v3700_v34, %v3724_v58 }
  0xd6   : > { %v3741_v6 = vpop.permute.xlu1 %2048  ;;  %v3749_v35 = vpop.permute.xlu0 %2044  ;;  %v1187_v1 = vcombine.high %v3680_v44, %v3677_v43 }
  0xd7   : > { %1093 = vrot.lane.b32.xlu0 %v1040_v5, %s3057_s9  ;;  %4848 = vst [vmem:[#allocation31_spill] sm:$0xff] %v3749_v35  ;;  %v528_v46 = vrot.slane %v520_v9, %v3359_v8  ;;  %v1920_v9 = vcombine.low %v3698_v48, %v3722_v32 }
  0xd8   : > { %v3856_v43 = vrot.slane %v1187_v1, %v3359_v8 }
  0xd9   : > { %1291 = vrot.lane.b32.xlu1 %v1218_v21, %s3054_s6  ;;  %v1448_v21 = vcombine.high %v3747_v25, %v4836_v27  ;;  %v1417_v25 = vcombine.high %v3708_v61, %v3705_v60  ;;  %v3849_v34 = vrot.slane %v1920_v9, %v3164_v18  ;;  %v1631_v9 = vcombine.high %v3717_v2, %v3714_v17 }
  0xda   : > { %v3758_v11 = vpop.permute.xlu1 %2056  ;;  %v3773_v57 = vpop.permute.xlu0 %2052  ;;  %v1731_v17 = vcombine.high %v1713_v7, %v4836_v27 }
  0xdb   : > { %1323 = vrot.lane.b32.xlu0 %v1269_v3, %s3055_s7  ;;  %v2150_v12 = vcombine.low %v3741_v6, %v3758_v11  ;;  %v3887_v2 = vrot.slane %v1631_v9, %v3359_v8  ;;  %v294_v9 = vcombine.high %v290_v45, %v4836_v27 }
  0xdd   : > { %1521 = vrot.lane.b32.xlu1 %v1448_v21, %s3054_s6 }
  0xde   : > { %v3776_v14 = vpop.permute.xlu1 %1816  ;;  %v3803_v37 = vpop.permute.xlu0 %1812 }
  0xdf   : > { %1553 = vrot.lane.b32.xlu0 %v1499_v19, %s3055_s7 }
  0xe1   : > { %1735 = vrot.lane.b32.xlu1 %v1662_v52, %s3054_s6  ;;  %v758_v52 = vrot.slane %v750_v10, %v3359_v8  ;;  %v1050_v10 = vcombine.high %v1040_v5, %v4836_v27  ;;  %v1287_v5 = vcombine.high %v1269_v3, %v4836_v27  ;;  %v3877_v3 = vrot.slane %v1417_v25, %v3359_v8 }
  0xe2   : > { %v3794_v4 = vpop.permute.xlu1 %1824  ;;  %v3817_v21 = vpop.permute.xlu0 %1820 }
  0xe3   : > { %1767 = vrot.lane.b32.xlu0 %v1713_v7, %s3055_s7 }
  0xe5   : > { %384 = vrot.lane.b32.xlu1 %v290_v45, %s3059_s11  ;;  %v819_v45 = vcombine.high %v3665_v54, %v3662_v62 }
  0xe6   : > { %v3812_v47 = vpop.permute.xlu1 %2046 }
  0xe7   : > { %416 = vrot.lane.b32.xlu0 %v362_v40, %s3060_s18  ;;  %v972_v40 = vrot.slane %v4851_v29, %v3359_v8  ;;  %v2134_v29 = vcombine.low %v3749_v35, %v3773_v57  ;;  %v3862_v35 = vrot.slane %v2150_v12, %v3164_v18  ;;  %v1517_v12 = vcombine.high %v1499_v19, %v4836_v27 }
  0xe8   : > { %v3936_v54 = vrot.slane %v819_v45, %v3359_v8 }
  0xe9   : > { %621 = vrot.lane.b32.xlu1 %v528_v46, %s3057_s9  ;;  %v3865_v60 = vrot.slane %v2134_v29, %v3164_v18  ;;  %v982_v62 = vcombine.high %v972_v40, %v4836_v27 }
  0xea   : > { %v3825_v42 = vpop.permute.xlu1 %2054 }
  0xeb   : > { %653 = vrot.lane.b32.xlu0 %v606_v33, %s3058_s10  ;;  %v3835_v33 = vpop.permute.xlu0 %2042  ;;  %v2082_v45 = vcombine.low %v3812_v47, %v3825_v42 }
  0xed   : > { %851 = vrot.lane.b32.xlu1 %v758_v52, %s3057_s9 }
  0xee   : > { %v3858_v44 = vpop.permute.xlu1 %364 }
  0xef   : > { %883 = vrot.lane.b32.xlu0 %v836_v24, %s3058_s10  ;;  %v3852_v24 = vrot.slane %v1904_v41, %v3164_v18  ;;  %v3867_v61 = vpop.permute.xlu0 %2050 }
  0xf1   : > { %1065 = vrot.lane.b32.xlu1 %v972_v40, %s3057_s9  ;;  %v1936_v41 = vcombine.low %v3852_v24, %v3849_v34  ;;  %v4856_v40 = vld [vmem:[#allocation5_spill] sm:$0xff] }
  0xf2   : > { %v3884_v1 = vpop.permute.xlu1 %368 }
  0xf3   : > { %1097 = vrot.lane.b32.xlu0 %v1050_v10, %s3058_s10  ;;  %v2166_v10 = vcombine.low %v3865_v60, %v3862_v35  ;;  %v3890_v29 = vpop.permute.xlu0 %392  ;;  %v3894_v25 = vrot.slane %v1936_v41, %v3359_v8 }
  0xf4   : > { %4852 = vst [vmem:[#allocation33_spill] sm:$0xff] %v3890_v29 }
  0xf5   : > { %1295 = vrot.lane.b32.xlu1 %v3856_v43, %s3055_s7  ;;  %4853 = vst [vmem:[#allocation34_spill] sm:$0xff] %v3894_v25  ;;  %v3899_v19 = vrot.slane %v2166_v10, %v3359_v8  ;;  %v1968_v7 = vcombine.high %v3894_v25, %v4836_v27  ;;  %v538_v10 = vcombine.high %v528_v46, %v4836_v27 }
  0xf7   : > { %1327 = vrot.lane.b32.xlu0 %v1287_v5, %s3056_s8  ;;  %4854 = vst [vmem:[#allocation35_spill] sm:$0xff] %v3899_v19  ;;  %v3901_v5 = vpop.permute.xlu1 %1081  ;;  %v3907_v29 = vpop.permute.xlu0 %396  ;;  %v2198_v41 = vcombine.high %v3899_v19, %v4836_v27  ;;  %v1223_v19 = vcombine.high %v3532_v31, %v3548_v20  ;;  %v1469_v31 = vcombine.high %v3568_v49, %v3584_v26 }
  0xf8   : > { %v1453_v20 = vcombine.high %v3570_v59, %v3586_v30  ;;  %v4857_v59 = vcombine.high %v3275_v50, %v3278_v51  ;;  %v1219_v50 = vcombine.high %v3856_v43, %v4836_v27 }
  0xf9   : > { %1525 = vrot.lane.b32.xlu1 %v3877_v3, %s3055_s7 }
  0xfa   : > { %v3967_v26 = vrot.slane %v4857_v59, %v3359_v8 }
  0xfb   : > { %1557 = vrot.lane.b32.xlu0 %v1517_v12, %s3056_s8  ;;  %v589_v12 = vcombine.high %v3648_v13, %v3634_v39  ;;  %v3925_v25 = vpop.permute.xlu0 %400  ;;  %v768_v39 = vcombine.high %v758_v52, %v4836_v27  ;;  %v1683_v52 = vcombine.high %v3291_v53, %v3301_v55  ;;  %v3972_v55 = vrot.slane %v1469_v31, %v3164_v18 }
  0xfd   : > { %1739 = vrot.lane.b32.xlu1 %v3887_v2, %s3055_s7  ;;  %v3929_v13 = vrot.slane %v589_v12, %v3359_v8  ;;  %v3979_v30 = vrot.slane %v1683_v52, %v3164_v18 }
  0xff   : > { %1771 = vrot.lane.b32.xlu0 %v1731_v17, %s3056_s8  ;;  %v3916_v17 = vpop.permute.xlu1 %404  ;;  %v3959_v49 = vpop.permute.xlu0 %372 }
 0x100   : > { %4855 = vst [vmem:[#allocation36_spill] sm:$0xff] %v3916_v17  ;;  %v4879_v17 = vld [vmem:[#allocation7_spill] sm:$0xff] }
 0x101   : > { %2001 = vrot.lane.b32.xlu1 %v1968_v7, %s3054_s6  ;;  %v1239_v7 = vcombine.high %v3530_v28, %v3546_v36  ;;  %v3942_v28 = vrot.slane %v1223_v19, %v3164_v18  ;;  %v1852_v19 = vcombine.low %v3776_v14, %v3794_v4 }
 0x103   : > { %2231 = vrot.lane.b32.xlu0 %v2198_v41, %s3054_s6  ;;  %v3939_v36 = vrot.slane %v1239_v7, %v3164_v18  ;;  %v3948_v46 = vpop.permute.xlu1 %1085  ;;  %v1836_v41 = vcombine.low %v3803_v37, %v3817_v21  ;;  %v3987_v51 = vrot.slane %v1852_v19, %v3164_v18  ;;  %v2066_v7 = vcombine.low %v3835_v33, %v3867_v61 }
 0x104   : > { %v1449_v19 = vcombine.high %v3877_v3, %v4836_v27 }
 0x105   : > { %388 = vrot.lane.b32.xlu1 %v294_v9, %s3060_s18  ;;  %v1667_v9 = vcombine.high %v4856_v40, %v3304_v56  ;;  %v1270_v53 = vcombine.low %v3942_v28, %v3939_v36  ;;  %v3975_v56 = vrot.slane %v1453_v20, %v3164_v18  ;;  %v4013_v40 = vrot.slane %v2082_v45, %v3164_v18 }
 0x107   : > { %625 = vrot.lane.b32.xlu0 %v538_v10, %s3058_s10  ;;  %v3982_v12 = vrot.slane %v1667_v9, %v3164_v18  ;;  %v3990_v10 = vrot.slane %v1836_v41, %v3164_v18  ;;  %v1500_v43 = vcombine.low %v3975_v56, %v3972_v55  ;;  %v4006_v31 = vrot.slane %v1270_v53, %v3359_v8 }
 0x108   : > { %v4016_v9 = vrot.slane %v2066_v7, %v3164_v18  ;;  %v1663_v53 = vcombine.high %v3887_v2, %v4836_v27 }
 0x109   : > { %657 = vrot.lane.b32.xlu1 %v3929_v13, %s3059_s11  ;;  %v1714_v20 = vcombine.low %v3982_v12, %v3979_v30  ;;  %v1868_v52 = vcombine.low %v3990_v10, %v3987_v51  ;;  %v4026_v59 = vrot.slane %v1500_v43, %v3359_v8  ;;  %v1937_v43 = vcombine.high %v3852_v24, %v3849_v34 }
 0x10a   : > { %v521_v24 = vcombine.high %v3782_v23, %v3779_v15  ;;  %v4866_v15 = vld [vmem:[#allocation19_spill] sm:$0xff] }
 0x10b   : > { %855 = vrot.lane.b32.xlu0 %v768_v39, %s3058_s10  ;;  %v3996_v39 = vpop.permute.xlu1 %408  ;;  %v4037_v3 = vrot.slane %v1714_v20, %v3359_v8  ;;  %v4040_v7 = vrot.slane %v1868_v52, %v3359_v8  ;;  %v2167_v52 = vcombine.high %v3865_v60, %v3862_v35  ;;  %v4060_v34 = vrot.slane %v1937_v43, %v3359_v8  ;;  %v4868_v43 = vld [vmem:[#allocation20_spill] sm:$0xff] }
 0x10c   : > { %4858 = vst [vmem:[#allocation5_spill] sm:$0xff] %v3996_v39  ;;  %v751_v60 = vcombine.high %v3800_v38, %v3797_v16  ;;  %v1171_v23 = vcombine.high %v4866_v15, %v3622_v22  ;;  %v607_v16 = vcombine.high %v3929_v13, %v4836_v27  ;;  %v4871_v15 = vld [vmem:[#allocation26_spill] sm:$0xff]  ;;  %v4876_v39 = vld [vmem:[#allocation8_spill] sm:$0xff] }
 0x10d   : > { %887 = vrot.lane.b32.xlu1 %v3936_v54, %s3059_s11  ;;  %4860 = vst [vmem:[#allocation38_spill] sm:$0xff] %v4040_v7  ;;  %v4074_v35 = vrot.slane %v2167_v52, %v3359_v8  ;;  %v4877_v13 = vld [vmem:[#allocation6_spill] sm:$0xff] }
 0x10e   : > { %v765_v38 = vrot.slane %v751_v60, %v3359_v8  ;;  %v4094_v22 = vrot.slane %v1171_v23, %v3164_v18  ;;  %v4878_v60 = vld [vmem:[#allocation9_spill] sm:$0xff] }
 0x10f   : > { %1069 = vrot.lane.b32.xlu0 %v982_v62, %s3058_s10  ;;  %v4002_v62 = vpop.permute.xlu0 %1053  ;;  %v4022_v41 = vpop.permute.xlu1 %641  ;;  %v1599_v23 = vcombine.high %v4879_v17, %v4878_v60 }
 0x110   : > { %4859 = vst [vmem:[#allocation37_spill] sm:$0xff] %v4022_v41  ;;  %v1900_v41 = vcombine.high %v4040_v7, %v4836_v27 }
 0x111   : > { %1101 = vrot.lane.b32.xlu1 %v3967_v26, %s3059_s11 }
 0x113   : > { %1299 = vrot.lane.b32.xlu0 %v1219_v50, %s3056_s8  ;;  %v2098_v50 = vcombine.low %v4016_v9, %v4013_v40  ;;  %v4032_v45 = vpop.permute.xlu0 %376 }
 0x115   : > { %1331 = vrot.lane.b32.xlu1 %v4006_v31, %s3057_s9  ;;  %v4054_v20 = vrot.slane %v2098_v50, %v3359_v8 }
 0x117   : > { %1529 = vrot.lane.b32.xlu0 %v1449_v19, %s3056_s8  ;;  %v4044_v19 = vpop.permute.xlu1 %871  ;;  %4863 = vst [vmem:[#allocation41_spill] sm:$0xff] %v4054_v20  ;;  %v2130_v50 = vcombine.high %v4054_v20, %v4836_v27  ;;  %v535_v20 = vrot.slane %v521_v24, %v3359_v8  ;;  %v4874_v24 = vld [vmem:[#allocation25_spill] sm:$0xff] }
 0x118   : > { %4861 = vst [vmem:[#allocation39_spill] sm:$0xff] %v4044_v19 }
 0x119   : > { %1561 = vrot.lane.b32.xlu1 %v4026_v59, %s3057_s9 }
 0x11b   : > { %1743 = vrot.lane.b32.xlu0 %v1663_v53, %s3056_s8  ;;  %v4064_v53 = vpop.permute.xlu1 %637 }
 0x11c   : > { %4864 = vst [vmem:[#allocation42_spill] sm:$0xff] %v4064_v53  ;;  %v1615_v53 = vcombine.high %v4877_v13, %v4876_v39 }
 0x11d   : > { %v4047_v2 = vpop.permute.xlu0 %613  ;;  %1775 = vrot.lane.b32.xlu1 %v4037_v3, %s3057_s9 }
 0x11e   : > { %4862 = vst [vmem:[#allocation40_spill] sm:$0xff] %v4047_v2 }
 0x11f   : > { %1973 = vrot.lane.b32.xlu0 %v1900_v41, %s3054_s6  ;;  %v4867_v41 = vld [vmem:[#allocation23_spill] sm:$0xff] }
 0x120   : > { %v1155_v7 = vcombine.high %v4868_v43, %v4867_v41  ;;  %v4872_v41 = vld [vmem:[#allocation24_spill] sm:$0xff] }
 0x121   : > { %v4066_v2 = vpop.permute.xlu0 %867  ;;  %2005 = vrot.lane.b32.xlu1 %v4060_v34, %s3055_s7  ;;  %v1401_v43 = vcombine.high %v4872_v41, %v4871_v15  ;;  %v4880_v15 = vcombine.high %v3334_v63, %v3340_v0  ;;  %v4133_v63 = vrot.slane %v1615_v53, %v3164_v18  ;;  %v4136_v0 = vrot.slane %v1599_v23, %v3164_v18 }
 0x122   : > { %4865 = vst [vmem:[#allocation43_spill] sm:$0xff] %v4066_v2  ;;  %v4097_v52 = vrot.slane %v1155_v7, %v3164_v18  ;;  %v837_v7 = vcombine.high %v3936_v54, %v4836_v27  ;;  %v1051_v54 = vcombine.high %v3967_v26, %v4836_v27  ;;  %v1288_v26 = vcombine.high %v4006_v31, %v4836_v27 }
 0x123   : > { %2203 = vrot.lane.b32.xlu0 %v2130_v50, %s3054_s6  ;;  %v4087_v50 = vpop.permute.xlu1 %645  ;;  %v1646_v53 = vcombine.low %v4136_v0, %v4133_v63  ;;  %v1869_v31 = vcombine.high %v3990_v10, %v3987_v51  ;;  %s2858_s6 = sshll.u32 %s191_s5, 5 }
 0x124   : > { %4870 = vst [vmem:[#allocation23_spill] sm:$0xff] %v4087_v50  ;;  %v1202_v41 = vcombine.low %v4097_v52, %v4094_v22 }
 0x125   : > { %v4082_v19 = vpop.permute.xlu0 %609  ;;  %2235 = vrot.lane.b32.xlu1 %v4074_v35, %s3055_s7  ;;  %v1883_v51 = vrot.slane %v1869_v31, %v3359_v8 }
 0x126   : > { %4869 = vst [vmem:[#allocation19_spill] sm:$0xff] %v4082_v19  ;;  %v4873_v19 = vld [vmem:[#allocation27_spill] sm:$0xff]  ;;  %v1210_v13 = vrot.slane %v1202_v41, %v3359_v8  ;;  %v1518_v41 = vcombine.high %v4026_v59, %v4836_v27 }
 0x127   : > { %629 = vrot.lane.b32.xlu0 %v535_v20, %s3059_s11  ;;  %v1385_v2 = vcombine.high %v4874_v24, %v4873_v19  ;;  %v979_v19 = vrot.slane %v4880_v15, %v3359_v8  ;;  %v4125_v17 = vpop.permute.xlu1 %875 }
 0x129   : > { %v4103_v50 = vpop.permute.xlu0 %839  ;;  %661 = vrot.lane.b32.xlu1 %v607_v16, %s3060_s18  ;;  %v4120_v16 = vrot.slane %v1401_v43, %v3164_v18  ;;  %v4123_v39 = vrot.slane %v1385_v2, %v3164_v18 }
 0x12a   : > { %4875 = vst [vmem:[#allocation20_spill] sm:$0xff] %v4103_v50  ;;  %v2099_v50 = vcombine.high %v4016_v9, %v4013_v40  ;;  %v2199_v9 = vcombine.high %v4074_v35, %v4836_v27 }
 0x12b   : > { %859 = vrot.lane.b32.xlu0 %v765_v38, %s3059_s11  ;;  %v1432_v2 = vcombine.low %v4123_v39, %v4120_v16  ;;  %v4145_v60 = vpop.permute.xlu1 %1089 }
 0x12d   : > { %v4127_v24 = vpop.permute.xlu0 %843  ;;  %891 = vrot.lane.b32.xlu1 %v837_v7, %s3060_s18  ;;  %v1440_v7 = vrot.slane %v1432_v2, %v3359_v8 }
 0x12e   : > { %4881 = vst [vmem:[#allocation26_spill] sm:$0xff] %v4127_v24 }
 0x12f   : > { %1073 = vrot.lane.b32.xlu0 %v979_v19, %s3059_s11 }
 0x131   : > { %v4141_v43 = vpop.permute.xlu0 %1057  ;;  %1105 = vrot.lane.b32.xlu1 %v1051_v54, %s3060_s18  ;;  %v1654_v54 = vrot.slane %v1646_v53, %v3359_v8 }
 0x133   : > { %1303 = vrot.lane.b32.xlu0 %v1210_v13, %s3057_s9 }
 0x135   : > { %v4152_v23 = vpop.permute.xlu0 %1319  ;;  %1335 = vrot.lane.b32.xlu1 %v1288_v26, %s3058_s10  ;;  %v1732_v26 = vcombine.high %v4037_v3, %v4836_v27  ;;  %v1969_v3 = vcombine.high %v4060_v34, %v4836_v27 }
 0x137   : > { %1533 = vrot.lane.b32.xlu0 %v1440_v7, %s3057_s9  ;;  %v4157_v15 = vpop.permute.xlu1 %1549 }
 0x139   : > { %v4164_v24 = vpop.permute.xlu0 %1763  ;;  %1565 = vrot.lane.b32.xlu1 %v1518_v41, %s3058_s10  ;;  %v2113_v41 = vrot.slane %v2099_v50, %v3359_v8  ;;  %v983_v50 = vcombine.high %v979_v19, %v4836_v27  ;;  %v4884_v19 = vld [vmem:[#allocation28_spill] sm:$0xff] }
 0x13b   : > { %1747 = vrot.lane.b32.xlu0 %v1654_v54, %s3057_s9  ;;  %v4170_v2 = vpop.permute.xlu1 %380 }
 0x13d   : > { %v4174_v59 = vpop.permute.xlu0 %412  ;;  %1779 = vrot.lane.b32.xlu1 %v1732_v26, %s3058_s10  ;;  %v539_v26 = vcombine.high %v535_v20, %v4836_v27  ;;  %v1220_v20 = vcombine.high %v1210_v13, %v4836_v27  ;;  %v1450_v13 = vcombine.high %v1440_v7, %v4836_v27 }
 0x13f   : > { %1977 = vrot.lane.b32.xlu0 %v1883_v51, %s3055_s7  ;;  %v4179_v10 = vpop.permute.xlu1 %617 }
 0x140   : > { %4882 = vst [vmem:[#allocation24_spill] sm:$0xff] %v4179_v10 }
 0x141   : > { %v4183_v53 = vpop.permute.xlu0 %649  ;;  %2009 = vrot.lane.b32.xlu1 %v1969_v3, %s3056_s8  ;;  %v769_v3 = vcombine.high %v765_v38, %v4836_v27  ;;  %v1921_v38 = vcombine.high %v3698_v48, %v3722_v32 }
 0x143   : > { %2207 = vrot.lane.b32.xlu0 %v2113_v41, %s3055_s7  ;;  %v4188_v40 = vpop.permute.xlu1 %847  ;;  %v4227_v32 = vrot.slane %v1921_v38, %v3164_v18  ;;  %v1901_v38 = vcombine.high %v1883_v51, %v4836_v27  ;;  %s4700_s7 = scalar_lea.vmem [#allocation2], %s2858_s6 }
 0x144   : > { %4883 = vst [vmem:[#allocation27_spill] sm:$0xff] %v4188_v40  ;;  %v1271_v40 = vcombine.high %v3942_v28, %v3939_v36 }
 0x145   : > { %v4192_v31 = vpop.permute.xlu0 %879  ;;  %2239 = vrot.lane.b32.xlu1 %v2199_v9, %s3056_s8  ;;  %v1501_v9 = vcombine.high %v3975_v56, %v3972_v55  ;;  %v1715_v55 = vcombine.high %v3982_v12, %v3979_v30  ;;  %v2151_v56 = vcombine.high %v3741_v6, %v3758_v11  ;;  %v1664_v30 = vcombine.high %v1654_v54, %v4836_v27 }
 0x146   : > { %v1285_v28 = vrot.slane %v1271_v40, %v3359_v8  ;;  %v4885_v40 = vld [vmem:[#allocation31_spill] sm:$0xff] }
 0x147   : > { %633 = vrot.lane.b32.xlu0 %v539_v26, %s3060_s18  ;;  %v4197_v34 = vpop.permute.xlu1 %1061  ;;  %v1905_v26 = vcombine.high %v4884_v19, %v3724_v58  ;;  %v1515_v48 = vrot.slane %v1501_v9, %v3359_v8  ;;  %v1729_v7 = vrot.slane %v1715_v55, %v3359_v8  ;;  %v4248_v11 = vrot.slane %v2151_v56, %v3164_v18 }
 0x148   : > { %v1203_v55 = vcombine.high %v4097_v52, %v4094_v22  ;;  %v1433_v22 = vcombine.high %v4123_v39, %v4120_v16  ;;  %v2067_v16 = vcombine.high %v3835_v33, %v3867_v61  ;;  %v4886_v61 = vld [vmem:[#allocation29_spill] sm:$0xff] }
 0x149   : > { %v4203_v10 = vpop.permute.xlu0 %1093  ;;  %863 = vrot.lane.b32.xlu1 %v769_v3, %s3060_s18  ;;  %v4231_v58 = vrot.slane %v1905_v26, %v3164_v18 }
 0x14a   : > { %v4317_v33 = vrot.slane %v2067_v16, %v3164_v18 }
 0x14b   : > { %1077 = vrot.lane.b32.xlu0 %v983_v50, %s3060_s18  ;;  %v4207_v35 = vpop.permute.xlu1 %1291  ;;  %v2135_v50 = vcombine.high %v4885_v40, %v3773_v57  ;;  %v1952_v9 = vcombine.low %v4231_v58, %v4227_v32  ;;  %v2131_v40 = vcombine.high %v2113_v41, %v4836_v27  ;;  %v1217_v41 = vrot.slane %v1203_v55, %v3359_v8 }
 0x14d   : > { %v4216_v36 = vpop.permute.xlu0 %1323  ;;  %1307 = vrot.lane.b32.xlu1 %v1220_v20, %s3058_s10  ;;  %v4251_v6 = vrot.slane %v2135_v50, %v3164_v18 }
 0x14f   : > { %1339 = vrot.lane.b32.xlu0 %v1285_v28, %s3059_s11  ;;  %v4221_v3 = vpop.permute.xlu1 %1521  ;;  %v2182_v19 = vcombine.low %v4251_v6, %v4248_v11 }
 0x151   : > { %v4237_v20 = vpop.permute.xlu0 %1553  ;;  %1537 = vrot.lane.b32.xlu1 %v1450_v13, %s3058_s10  ;;  %v1960_v13 = vrot.slane %v1952_v9, %v3359_v8  ;;  %v2190_v51 = vrot.slane %v2182_v19, %v3359_v8  ;;  %v1837_v9 = vcombine.high %v3803_v37, %v3817_v21  ;;  %v1289_v19 = vcombine.high %v1285_v28, %v4836_v27 }
 0x152   : > { %v2083_v21 = vcombine.high %v3812_v47, %v3825_v42  ;;  %v1447_v28 = vrot.slane %v1433_v22, %v3359_v8 }
 0x153   : > { %1569 = vrot.lane.b32.xlu0 %v1515_v48, %s3059_s11  ;;  %v4242_v12 = vpop.permute.xlu1 %1735  ;;  %v4296_v37 = vrot.slane %v1837_v9, %v3164_v18 }
 0x154   : > { %v4314_v42 = vrot.slane %v2083_v21, %v3164_v18 }
 0x155   : > { %v4253_v57 = vpop.permute.xlu0 %1767  ;;  %1751 = vrot.lane.b32.xlu1 %v1664_v30, %s3058_s10  ;;  %v1853_v30 = vcombine.high %v3776_v14, %v3794_v4  ;;  %v1647_v14 = vcombine.high %v4136_v0, %v4133_v63  ;;  %v1519_v63 = vcombine.high %v1515_v48, %v4836_v27 }
 0x157   : > { %1783 = vrot.lane.b32.xlu0 %v1729_v7, %s3059_s11  ;;  %v4257_v54 = vpop.permute.xlu1 %384  ;;  %v4293_v4 = vrot.slane %v1853_v30, %v3164_v18  ;;  %v1661_v0 = vrot.slane %v1647_v14, %v3359_v8  ;;  %v1733_v30 = vcombine.high %v1729_v7, %v4836_v27  ;;  %v2114_v18 = vcombine.low %v4317_v33, %v4314_v42  ;;  %v4888_v7 = vld [vmem:[#allocation10_spill] sm:$0xff] }
 0x158   : > { %v420_v16 = vsel %vm419_vm0, %v4888_v7, %v3858_v44 }
 0x159   : > { %v4262_v26 = vpop.permute.xlu0 %416  ;;  %1981 = vrot.lane.b32.xlu1 %v1901_v38, %s3056_s8  ;;  %v1884_v47 = vcombine.low %v4296_v37, %v4293_v4  ;;  %v422_v44 = vsel %vm421_vm1, %v420_v16, %v3884_v1 }
 0x15a   : > { %v424_v16 = vsel %vm423_vm2, %v422_v44, %v3959_v49  ;;  %v1451_v49 = vcombine.high %v1447_v28, %v4836_v27 }
 0x15b   : > { %2013 = vrot.lane.b32.xlu0 %v1960_v13, %s3057_s9  ;;  %v4269_v56 = vpop.permute.xlu1 %621  ;;  %v1892_v21 = vrot.slane %v1884_v47, %v3359_v8  ;;  %v1970_v47 = vcombine.high %v1960_v13, %v4836_v27 }
 0x15d   : > { %v4272_v50 = vpop.permute.xlu0 %653  ;;  %2211 = vrot.lane.b32.xlu1 %v2131_v40, %s3056_s8  ;;  %v1346_v40 = vsel %vm419_vm0, %v4886_v61, %v4207_v35  ;;  %s2730_s8 = sshll.u32 %s4700_s7, 4  ;;  %s4720_s8 = int_to_ptr.vmem [resolvable:$true] %s2730_s8 }
 0x15e   : > { %s2971_s21 = scalar_lea.vmem %s4720_s8, 512  ;;  %p2978_p1 = scmp.lt.s32.totalorder %s4720_s8, %s2976_s27 }
 0x15f   : > { %2243 = vrot.lane.b32.xlu0 %v2190_v51, %s3057_s9  ;;  %v4283_v52 = vpop.permute.xlu1 %851  ;;  %p2972_p12 = scmp.ne.s32.totalorder %s4720_s8, %s2971_s21  ;;  %p2979_p2 = scmp.lt.s32.totalorder %s2977_s28, %s2971_s21 }
 0x161   : > { %v4286_v38 = vpop.permute.xlu0 %883  ;;  %1311 = vrot.lane.b32.xlu1 %v1217_v41, %s3059_s11  ;;  %p2973_p13 = pnand %p2972_p12, %p3124_p4  ;;  %p2980_p3 = por %p2979_p2, %p2978_p1 }
 0x163   : > { %1343 = vrot.lane.b32.xlu0 %v1289_v19, %s3060_s18  ;;  %v4303_v39 = vpop.permute.xlu1 %1065  ;;  %v4887_v19 = vld [vmem:[#allocation30_spill] sm:$0xff]  ;;  %p2974_p0 = pneg %p2973_p13 }
 0x164   : > { %v1576_v14 = vsel %vm419_vm0, %v4887_v19, %v4221_v3 }
 0x165   : > { %v4306_v55 = vpop.permute.xlu0 %1097  ;;  %1541 = vrot.lane.b32.xlu1 %v1447_v28, %s3059_s11  ;;  %p2981_p5 = pnand %p2980_p3, %p2974_p0 }
 0x167   : > { %1573 = vrot.lane.b32.xlu0 %v1519_v63, %s3060_s18  ;;  %v1296_v48 = vpop.permute.xlu1 %1295  ;;  %v4889_v63 = vld [vmem:[#allocation22_spill] sm:$0xff] }
 0x168   : > { %v4325_v9 = vsel %vm421_vm1, %v1346_v40, %v1296_v48  ;;  %v1583_v61 = vsel %vm419_vm0, %v4889_v63, %v4157_v15  ;;  %v4890_v15 = vld [vmem:[#allocation32_spill] sm:$0xff] }
 0x169   : > { %v4327_v22 = vpop.permute.xlu0 %1327  ;;  %1755 = vrot.lane.b32.xlu1 %v1661_v0, %s3059_s11  ;;  %v1584_v3 = vsel %vm421_vm1, %v1583_v61, %v4237_v20  ;;  %v1790_v19 = vsel %vm419_vm0, %v4890_v15, %v4242_v12  ;;  %v2122_v20 = vrot.slane %v2114_v18, %v3359_v8  ;;  %v2200_v12 = vcombine.high %v2190_v51, %v4836_v27  ;;  %v4892_v15 = vld [vmem:[#allocation12_spill] sm:$0xff] }
 0x16a   : > { %v1221_v61 = vcombine.high %v1217_v41, %v4836_v27  ;;  %v1665_v51 = vcombine.high %v1661_v0, %v4836_v27  ;;  %v1953_v41 = vcombine.high %v4231_v58, %v4227_v32  ;;  %v2183_v0 = vcombine.high %v4251_v6, %v4248_v11  ;;  %v4893_v11 = vld [vmem:[#allocation13_spill] sm:$0xff] }
 0x16b   : > { %1787 = vrot.lane.b32.xlu0 %v1733_v30, %s3060_s18  ;;  %v1526_v35 = vpop.permute.xlu1 %1525  ;;  %v1108_v6 = vsel %vm419_vm0, %v4893_v11, %v4002_v62 }
 0x16c   : > { %v4344_v40 = vsel %vm421_vm1, %v1576_v14, %v1526_v35  ;;  %v4891_v35 = vld [vmem:[#allocation21_spill] sm:$0xff]  ;;  %v1967_v58 = vrot.slane %v1953_v41, %v3359_v8 }
 0x16d   : > { %v1558_v48 = vpop.permute.xlu0 %1557  ;;  %1985 = vrot.lane.b32.xlu1 %v1892_v21, %s3057_s9  ;;  %v1797_v7 = vsel %vm419_vm0, %v4891_v35, %v4164_v24  ;;  %v1109_v35 = vsel %vm421_vm1, %v1108_v6, %v4141_v43  ;;  %v4897_v6 = vld [vmem:[#allocation36_spill] sm:$0xff] }
 0x16e   : > { %v4351_v30 = vsel %vm423_vm2, %v1584_v3, %v1558_v48  ;;  %v1798_v63 = vsel %vm421_vm1, %v1797_v7, %v4253_v57  ;;  %v426_v57 = vsel %vm425_vm3, %v424_v16, %v4032_v45  ;;  %v1110_v7 = vsel %vm423_vm2, %v1109_v35, %v4197_v34  ;;  %v4898_v35 = vld [vmem:[#allocation34_spill] sm:$0xff] }
 0x16f   : > { %2017 = vrot.lane.b32.xlu0 %v1970_v47, %s3058_s10  ;;  %v1740_v14 = vpop.permute.xlu1 %1739  ;;  %v428_v48 = vsel %vm427_vm4, %v426_v57, %v4170_v2  ;;  %v1902_v2 = vcombine.high %v1892_v21, %v4836_v27  ;;  %v2132_v21 = vcombine.high %v2122_v20, %v4836_v27  ;;  %v1111_v43 = vsel %vm425_vm3, %v1110_v7, %v4303_v39  ;;  %v4900_v7 = vld [vmem:[#allocation14_spill] sm:$0xff] }
 0x170   : > { %v4364_v13 = vsel %vm421_vm1, %v1790_v19, %v1740_v14  ;;  %v430_v47 = vsel %vm429_vm5, %v428_v48, %v4257_v54  ;;  %v1885_v54 = vcombine.high %v4296_v37, %v4293_v4  ;;  %v1115_v19 = vsel %vm419_vm0, %v4892_v15, %v3901_v5 }
 0x171   : > { %v1772_v1 = vpop.permute.xlu0 %1771  ;;  %2215 = vrot.lane.b32.xlu1 %v2122_v20, %s3057_s9  ;;  %v2197_v37 = vrot.slane %v2183_v0, %v3359_v8  ;;  %v1116_v5 = vsel %vm421_vm1, %v1115_v19, %v3948_v46  ;;  %v2115_v20 = vcombine.high %v4317_v33, %v4314_v42  ;;  %v1971_v42 = vcombine.high %v1967_v58, %v4836_v27  ;;  %v4894_v33 = vld [vmem:[#allocation18_spill] sm:$0xff]  ;;  %s2876_s9 = sshll.u32 %s3039_s15, 9 }
 0x172   : > { %v4373_v18 = vsel %vm423_vm2, %v1798_v63, %v1772_v1  ;;  %v1117_v62 = vsel %vm423_vm2, %v1116_v5, %v4145_v60  ;;  %v1899_v1 = vrot.slane %v1885_v54, %v3359_v8  ;;  %v1353_v16 = vsel %vm419_vm0, %v4894_v33, %v4152_v23  ;;  %v4899_v5 = vld [vmem:[#allocation42_spill] sm:$0xff] }
 0x173   : > { %2247 = vrot.lane.b32.xlu0 %v2200_v12, %s3058_s10  ;;  %v4376_v24 = vpop.permute.xlu1 %2001  ;;  %v1118_v46 = vsel %vm425_vm3, %v1117_v62, %v4203_v10  ;;  %v2129_v10 = vrot.slane %v2115_v20, %v3359_v8  ;;  %v2201_v23 = vcombine.high %v2197_v37, %v4836_v27 }
 0x174   : > { %v1119_v34 = vsel %vm427_vm4, %v1118_v46, %v4306_v55  ;;  %v1354_v55 = vsel %vm421_vm1, %v1353_v16, %v4216_v36  ;;  %v1903_v8 = vcombine.high %v1899_v1, %v4836_v27  ;;  %v4895_v36 = vld [vmem:[#allocation33_spill] sm:$0xff]  ;;  %v4906_v16 = vld [vmem:[#allocation23_spill] sm:$0xff] }
 0x175   : > { %v4381_v3 = vpop.permute.xlu0 %2231  ;;  %1315 = vrot.lane.b32.xlu1 %v1221_v61, %s3060_s18  ;;  %v4904_v46 = vld [vmem:[#allocation37_spill] sm:$0xff] }
 0x177   : > { %1545 = vrot.lane.b32.xlu0 %v1451_v49, %s3060_s18  ;;  %v389_v45 = vpop.permute.xlu1 %388  ;;  %v1355_v49 = vsel %vm423_vm2, %v1354_v55, %v4327_v22 }
 0x178   : > { %v4394_v44 = vsel %vm431_vm6, %v430_v47, %v389_v45  ;;  %v4896_v47 = vld [vmem:[#allocation11_spill] sm:$0xff] }
 0x179   : > { %v4396_v28 = vpop.permute.xlu0 %625  ;;  %1759 = vrot.lane.b32.xlu1 %v1665_v51, %s3060_s18 }
 0x17b   : > { %1989 = vrot.lane.b32.xlu0 %v1902_v2, %s3058_s10  ;;  %v4403_v32 = vpop.permute.xlu1 %657  ;;  %v2133_v2 = vcombine.high %v2129_v10, %v4836_v27 }
 0x17d   : > { %v4411_v14 = vpop.permute.xlu0 %855  ;;  %2021 = vrot.lane.b32.xlu1 %v1967_v58, %s3059_s11 }
 0x17f   : > { %2219 = vrot.lane.b32.xlu0 %v2132_v21, %s3058_s10  ;;  %v4421_v4 = vpop.permute.xlu1 %887 }
 0x181   : > { %v1070_v63 = vpop.permute.xlu0 %1069  ;;  %2251 = vrot.lane.b32.xlu1 %v2197_v37, %s3059_s11 }
 0x182   : > { %v4439_v12 = vsel %vm427_vm4, %v1111_v43, %v1070_v63  ;;  %v4903_v63 = vld [vmem:[#allocation15_spill] sm:$0xff] }
 0x183   : > { %1993 = vrot.lane.b32.xlu0 %v1899_v1, %s3059_s11  ;;  %v1102_v60 = vpop.permute.xlu1 %1101 }
 0x184   : > { %v4446_v39 = vsel %vm429_vm5, %v1119_v34, %v1102_v60  ;;  %v4905_v60 = vld [vmem:[#allocation35_spill] sm:$0xff] }
 0x185   : > { %v1300_v61 = vpop.permute.xlu0 %1299  ;;  %2025 = vrot.lane.b32.xlu1 %v1971_v42, %s3060_s18  ;;  %v2265_v42 = vsel %vm419_vm0, %v4905_v60, %v4381_v3 }
 0x186   : > { %v4457_v57 = vsel %vm423_vm2, %v4325_v9, %v1300_v61  ;;  %v433_v9 = vsel %vm419_vm0, %v4896_v47, %v4895_v36 }
 0x187   : > { %2223 = vrot.lane.b32.xlu0 %v2129_v10, %s3059_s11  ;;  %v1332_v51 = vpop.permute.xlu1 %1331  ;;  %v434_v58 = vsel %vm421_vm1, %v433_v9, %v3907_v29  ;;  %v2035_v29 = vsel %vm419_vm0, %v4898_v35, %v4376_v24 }
 0x188   : > { %v4464_v48 = vsel %vm425_vm3, %v1355_v49, %v1332_v51  ;;  %v435_v19 = vsel %vm423_vm2, %v434_v58, %v3925_v25  ;;  %v4901_v25 = vld [vmem:[#allocation5_spill] sm:$0xff]  ;;  %v4907_v49 = vld [vmem:[#allocation39_spill] sm:$0xff] }
 0x189   : > { %v1530_v41 = vpop.permute.xlu0 %1529  ;;  %2255 = vrot.lane.b32.xlu1 %v2201_v23, %s3060_s18 }
 0x18a   : > { %v4473_v22 = vsel %vm423_vm2, %v4344_v40, %v1530_v41 }
 0x18b   : > { %1997 = vrot.lane.b32.xlu0 %v1903_v8, %s3060_s18  ;;  %v1562_v45 = vpop.permute.xlu1 %1561 }
 0x18c   : > { %v4479_v0 = vsel %vm425_vm3, %v4351_v30, %v1562_v45  ;;  %v436_v30 = vsel %vm425_vm3, %v435_v19, %v4897_v6 }
 0x18d   : > { %v1744_v54 = vpop.permute.xlu0 %1743  ;;  %2227 = vrot.lane.b32.xlu1 %v2133_v2, %s3060_s18  ;;  %v437_v43 = vsel %vm427_vm4, %v436_v30, %v4901_v25  ;;  %v4909_v25 = vld [vmem:[#allocation19_spill] sm:$0xff]  ;;  %s4726_s18 = scalar_lea.hbm %s4781_s2, %s2876_s9 }
 0x18e   : > { %v1792_v15 = vsel %vm423_vm2, %v4364_v13, %v1744_v54  ;;  %v671_v13 = vsel %vm419_vm0, %v4900_v7, %v4899_v5  ;;  %v438_v24 = vsel %vm429_vm5, %v437_v43, %v4174_v59  ;;  %v4910_v43 = vld [vmem:[#allocation16_spill] sm:$0xff] }
 0x18f   : > { %v1776_v40 = vpop.permute.xlu1 %1775  ;;  %v672_v34 = vsel %vm421_vm1, %v671_v13, %v4904_v46  ;;  %v439_v10 = vsel %vm431_vm6, %v438_v24, %v4262_v26 }
 0x190   : > { %v1800_v21 = vsel %vm425_vm3, %v4373_v18, %v1776_v40  ;;  %v4902_v18 = vld [vmem:[#allocation43_spill] sm:$0xff]  ;;  %v673_v61 = vsel %vm423_vm2, %v672_v34, %v4906_v16  ;;  %v2281_v3 = vrot.slane %v439_v10, 4  ;;  %v4915_v16 = vld [vmem:[#allocation24_spill] sm:$0xff] }
 0x191   : > { %v1974_v11 = vpop.permute.xlu0 %1973  ;;  %v901_v1 = vsel %vm419_vm0, %v4903_v63, %v4902_v18  ;;  %v674_v23 = vsel %vm425_vm3, %v673_v61, %v4183_v53  ;;  %v664_v18 = vsel %vm419_vm0, %v4910_v43, %v4909_v25 }
 0x192   : > { %v902_v51 = vsel %vm421_vm1, %v901_v1, %v4907_v49  ;;  %v675_v41 = vsel %vm427_vm4, %v674_v23, %v4272_v50  ;;  %v4916_v49 = vld [vmem:[#allocation26_spill] sm:$0xff] }
 0x193   : > { %v2006_v37 = vpop.permute.xlu1 %2005  ;;  %v676_v8 = vsel %vm429_vm5, %v675_v41, %v4403_v32  ;;  %v903_v26 = vsel %vm423_vm2, %v902_v51, %v4125_v17  ;;  %v4917_v41 = vld [vmem:[#allocation27_spill] sm:$0xff] }
 0x194   : > { %v2036_v20 = vsel %vm421_vm1, %v2035_v29, %v2006_v37  ;;  %v904_v9 = vsel %vm425_vm3, %v903_v26, %v4192_v31  ;;  %v2280_v26 = vrot.slane %v4394_v44, 4 }
 0x195   : > { %v2204_v62 = vpop.permute.xlu0 %2203  ;;  %v905_v50 = vsel %vm427_vm4, %v904_v9, %v4286_v38 }
 0x196   : > { %v906_v2 = vsel %vm429_vm5, %v905_v50, %v4421_v4 }
 0x197   : > { %v2236_v33 = vpop.permute.xlu1 %2235 }
 0x198   : > { %v2266_v55 = vsel %vm421_vm1, %v2265_v42, %v2236_v33  ;;  %v4914_v42 = vld [vmem:[#allocation17_spill] sm:$0xff] }
 0x199   : > { %v630_v59 = vpop.permute.xlu0 %629 }
 0x19b   : > { %v662_v36 = vpop.permute.xlu1 %661 }
 0x19c   : > { %v677_v47 = vsel %vm431_vm6, %v676_v8, %v662_v36 }
 0x19d   : > { %v860_v45 = vpop.permute.xlu0 %859  ;;  %v2288_v53 = vsel %vm2284_vm7, %v677_v47, %v2281_v3 }
 0x19e   : > { %2321 = vmatprep.subr.mxu0 %v2288_v53 }
 0x19f   : > { %v892_v32 = vpop.permute.xlu1 %891 }
 0x1a0   : > { %v907_v58 = vsel %vm431_vm6, %v906_v2, %v892_v32 }
 0x1a1   : > { %v2392_v54 = vrot.slane %v907_v58, 4  ;;  %v1074_v17 = vpop.permute.xlu0 %1073 }
 0x1a2   : > { %v4537_v40 = vsel %vm429_vm5, %v4439_v12, %v1074_v17  ;;  %v4908_v12 = vld [vmem:[#allocation38_spill] sm:$0xff] }
 0x1a3   : > { %v1106_v31 = vpop.permute.xlu1 %1105  ;;  %v2398_v19 = vsel %vm2284_vm7, %v677_v47, %v2392_v54  ;;  %v2028_v7 = vsel %vm419_vm0, %v4908_v12, %v1974_v11  ;;  %v4913_v11 = vld [vmem:[#allocation20_spill] sm:$0xff] }
 0x1a4   : > { %2432 = vmatprep.subr.mxu1 %v2398_v19  ;;  %v894_v33 = vsel %vm419_vm0, %v4914_v42, %v4913_v11 }
 0x1a5   : > { %v4540_v6 = vpop.permute.xlu0 %1303 }
 0x1a7   : > { %v1336_v38 = vpop.permute.xlu1 %1335 }
 0x1a8   : > { %v1357_v25 = vsel %vm427_vm4, %v4464_v48, %v1336_v38 }
 0x1a9   : > { %v4542_v30 = vpop.permute.xlu0 %1533 }
 0x1ab   : > { %v1566_v35 = vpop.permute.xlu1 %1565 }
 0x1ad   : > { %v1748_v4 = vpop.permute.xlu0 %1747 }
 0x1ae   : > { %v4545_v29 = vsel %vm425_vm3, %v1792_v15, %v1748_v4  ;;  %v4911_v15 = vld [vmem:[#allocation40_spill] sm:$0xff] }
 0x1af   : > { %v1780_v37 = vpop.permute.xlu1 %1779  ;;  %v665_v34 = vsel %vm421_vm1, %v664_v18, %v4911_v15 }
 0x1b0   : > { %v4548_v5 = vsel %vm427_vm4, %v1800_v21, %v1780_v37  ;;  %v4912_v21 = vld [vmem:[#allocation41_spill] sm:$0xff]  ;;  %v666_v61 = vsel %vm423_vm2, %v665_v34, %v4915_v16 }
 0x1b1   : > { %v1978_v13 = vpop.permute.xlu0 %1977  ;;  %v2258_v24 = vsel %vm419_vm0, %v4912_v21, %v2204_v62  ;;  %v667_v51 = vsel %vm425_vm3, %v666_v61, %v4269_v56 }
 0x1b2   : > { %v4556_v63 = vsel %vm421_vm1, %v2028_v7, %v1978_v13  ;;  %v668_v3 = vsel %vm427_vm4, %v667_v51, %v4396_v28  ;;  %v1121_v7 = vsel %vm431_vm6, %v4446_v39, %v1106_v31  ;;  %v1579_v51 = vsel %vm425_vm3, %v4473_v22, %v4542_v30 }
 0x1b3   : > { %v2010_v1 = vpop.permute.xlu1 %2009  ;;  %v669_v47 = vsel %vm429_vm5, %v668_v3, %v630_v59  ;;  %v2275_v43 = vrot.slane %v1121_v7, 4 }
 0x1b4   : > { %v4559_v46 = vsel %vm423_vm2, %v2036_v20, %v2010_v1  ;;  %v895_v20 = vsel %vm421_vm1, %v894_v33, %v4916_v49 }
 0x1b5   : > { %v2208_v60 = vpop.permute.xlu0 %2207  ;;  %v896_v62 = vsel %vm423_vm2, %v895_v20, %v4917_v41 }
 0x1b6   : > { %v4571_v10 = vsel %vm421_vm1, %v2258_v24, %v2208_v60  ;;  %v897_v36 = vsel %vm425_vm3, %v896_v62, %v4283_v52  ;;  %v1587_v24 = vsel %vm427_vm4, %v4479_v0, %v1566_v35  ;;  %v1349_v35 = vsel %vm425_vm3, %v4457_v57, %v4540_v6 }
 0x1b7   : > { %v2240_v23 = vpop.permute.xlu1 %2239  ;;  %v898_v56 = vsel %vm427_vm4, %v897_v36, %v4411_v14 }
 0x1b8   : > { %v4582_v8 = vsel %vm423_vm2, %v2266_v55, %v2240_v23  ;;  %v899_v50 = vsel %vm429_vm5, %v898_v56, %v860_v45 }
 0x1b9   : > { %v634_v9 = vpop.permute.xlu0 %633 }
 0x1ba   : > { %v670_v53 = vsel %vm431_vm6, %v669_v47, %v634_v9  ;;  %v2862_v9 = vld [vmem:[%s4780_s1 + $0x4] sm:$0xf] }
 0x1bb   : > { %v864_v2 = vpop.permute.xlu1 %863  ;;  %v2287_v28 = vsel %vm2284_vm7, %v670_v53, %v2280_v26 }
 0x1bc   : > { %v900_v55 = vsel %vm431_vm6, %v899_v50, %v864_v2  ;;  %2322 = vmatpush1.msra.mxu0 %v2287_v28 }
 0x1bd   : > { %v2391_v32 = vrot.slane %v900_v55, 4  ;;  %v1078_v52 = vpop.permute.xlu0 %1077 }
 0x1be   : > { %v1114_v0 = vsel %vm431_vm6, %v4537_v40, %v1078_v52  ;;  %v2289_v40 = vld [vmem:[%s4780_s1] sm:$0xf] }
 0x1bf   : > { %v1308_v58 = vpop.permute.xlu1 %1307  ;;  %v2397_v44 = vsel %vm2284_vm7, %v670_v53, %v2391_v32  ;;  %v2274_v23 = vrot.slane %v1114_v0, 4 }
 0x1c0   : > { %2433 = vmatpush1.msra.mxu1 %v2397_v44  ;;  %v1350_v20 = vsel %vm427_vm4, %v1349_v35, %v1308_v58 }
 0x1c1   : > { %v1340_v59 = vpop.permute.xlu0 %1339 }
 0x1c2   : > { %v1358_v18 = vsel %vm429_vm5, %v1357_v25, %v1340_v59 }
 0x1c3   : > { %v1538_v54 = vpop.permute.xlu1 %1537 }
 0x1c4   : > { %v1580_v3 = vsel %vm427_vm4, %v1579_v51, %v1538_v54 }
 0x1c5   : > { %v1570_v17 = vpop.permute.xlu0 %1569 }
 0x1c6   : > { %v1588_v39 = vsel %vm429_vm5, %v1587_v24, %v1570_v17 }
 0x1c7   : > { %v4595_v14 = vpop.permute.xlu1 %1751 }
 0x1c9   : > { %v1784_v19 = vpop.permute.xlu0 %1783 }
 0x1ca   : > { %v1802_v28 = vsel %vm429_vm5, %v4548_v5, %v1784_v19 }
 0x1cb   : > { %v4597_v4 = vpop.permute.xlu1 %1981 }
 0x1cd   : > { %v2014_v45 = vpop.permute.xlu0 %2013 }
 0x1ce   : > { %v2038_v52 = vsel %vm425_vm3, %v4559_v46, %v2014_v45 }
 0x1cf   : > { %v4599_v37 = vpop.permute.xlu1 %2211 }
 0x1d1   : > { %v4601_v12 = vpop.permute.xlu0 %2243 }
 0x1d2   : > { %v2268_v5 = vsel %vm425_vm3, %v4582_v8, %v4601_v12  ;;  %v2260_v8 = vsel %vm423_vm2, %v4571_v10, %v4599_v37 }
 0x1d3   : > { %v1312_v13 = vpop.permute.xlu1 %1311 }
 0x1d4   : > { %v1351_v41 = vsel %vm429_vm5, %v1350_v20, %v1312_v13  ;;  %v2030_v13 = vsel %vm423_vm2, %v4556_v63, %v4597_v4 }
 0x1d5   : > { %v1344_v1 = vpop.permute.xlu0 %1343 }
 0x1d6   : > { %v1359_v15 = vsel %vm431_vm6, %v1358_v18, %v1344_v1 }
 0x1d7   : > { %v1542_v34 = vpop.permute.xlu1 %1541  ;;  %v4610_v21 = vsel %vm2284_vm7, %v1359_v15, %v2275_v43 }
 0x1d8   : > { %2323 = vmatprep.subr.mxu0 %v4610_v21  ;;  %v1581_v57 = vsel %vm429_vm5, %v1580_v3, %v1542_v34 }
 0x1d9   : > { %v1574_v31 = vpop.permute.xlu0 %1573 }
 0x1da   : > { %v1589_v48 = vsel %vm431_vm6, %v1588_v39, %v1574_v31 }
 0x1db   : > { %v2386_v38 = vrot.slane %v1589_v48, 4  ;;  %v1756_v60 = vpop.permute.xlu1 %1755 }
 0x1dd   : > { %v1788_v11 = vpop.permute.xlu0 %1787  ;;  %v4618_v42 = vsel %vm2284_vm7, %v1359_v15, %v2386_v38 }
 0x1de   : > { %2434 = vmatprep.subr.mxu1 %v4618_v42  ;;  %v1803_v32 = vsel %vm431_vm6, %v1802_v28, %v1788_v11  ;;  %v2865_v11 = vld [vmem:[%s4780_s1 + $0x8] sm:$0xf] }
 0x1df   : > { %v1986_v33 = vpop.permute.xlu1 %1985  ;;  %v2498_v59 = vrot.slane %v1803_v32, 4 }
 0x1e1   : > { %v2018_v16 = vpop.permute.xlu0 %2017 }
 0x1e2   : > { %v2039_v44 = vsel %vm427_vm4, %v2038_v52, %v2018_v16 }
 0x1e3   : > { %v2216_v61 = vpop.permute.xlu1 %2215 }
 0x1e4   : > { %v2261_v63 = vsel %vm425_vm3, %v2260_v8, %v2216_v61  ;;  %v2868_v61 = vld [vmem:[%s4780_s1 + $0xc] sm:$0xf] }
 0x1e5   : > { %v2248_v49 = vpop.permute.xlu0 %2247 }
 0x1e6   : > { %v2269_v25 = vsel %vm427_vm4, %v2268_v5, %v2248_v49 }
 0x1e7   : > { %v1316_v62 = vpop.permute.xlu1 %1315 }
 0x1e8   : > { %v1352_v36 = vsel %vm431_vm6, %v1351_v41, %v1316_v62 }
 0x1e9   : > { %v1546_v6 = vpop.permute.xlu0 %1545  ;;  %v2285_v26 = vsel %vm2284_vm7, %v1352_v36, %v2274_v23 }
 0x1ea   : > { %v1582_v47 = vsel %vm431_vm6, %v1581_v57, %v1546_v6  ;;  %2324 = vmatpush1.msra.mxu0 %v2285_v26 }
 0x1eb   : > { %v2385_v22 = vrot.slane %v1582_v47, 4  ;;  %v1760_v30 = vpop.permute.xlu1 %1759  ;;  %2861 = vmatmul.mubr.msk.f32.vlgmr.msra.gmra.mxu0 %vm419_vm0, %v2289_v40 }
 0x1ec   : > { %2572 = vmatprep.mubr.f32.mxu0 %v4836_v27 }
 0x1ed   : > { %v1990_v56 = vpop.permute.xlu0 %1989  ;;  %v2395_v53 = vsel %vm2284_vm7, %v1352_v36, %v2385_v22 }
 0x1ee   : > { %2435 = vmatpush1.msra.mxu1 %v2395_v53 }
 0x1ef   : > { %v2022_v50 = vpop.permute.xlu1 %2021  ;;  %2863 = vmatmul.mubr.msk.f32.vlgmr.msra.gmra.mxu1 %vm419_vm0, %v2862_v9 }
 0x1f0   : > { %2676 = vmatprep.mubr.f32.mxu1 %v4836_v27  ;;  %v2040_v54 = vsel %vm429_vm5, %v2039_v44, %v2022_v50  ;;  %v1794_v27 = vsel %vm427_vm4, %v4545_v29, %v4595_v14  ;;  %v2031_v29 = vsel %vm425_vm3, %v2030_v13, %v1986_v33 }
 0x1f1   : > { %v2220_v2 = vpop.permute.xlu0 %2219  ;;  %v1795_v19 = vsel %vm429_vm5, %v1794_v27, %v1756_v60  ;;  %v2032_v12 = vsel %vm427_vm4, %v2031_v29, %v1990_v56 }
 0x1f2   : > { %v1796_v43 = vsel %vm431_vm6, %v1795_v19, %v1760_v30  ;;  %v2262_v39 = vsel %vm427_vm4, %v2261_v63, %v2220_v2 }
 0x1f3   : > { %v2252_v55 = vpop.permute.xlu1 %2251  ;;  %v2497_v4 = vrot.slane %v1796_v43, 4 }
 0x1f4   : > { %v2270_v14 = vsel %vm429_vm5, %v2269_v25, %v2252_v55 }
 0x1f5   : > { %v1994_v58 = vpop.permute.xlu0 %1993 }
 0x1f6   : > { %v2033_v15 = vsel %vm429_vm5, %v2032_v12, %v1994_v58 }
 0x1f7   : > { %v2026_v17 = vpop.permute.xlu1 %2025 }
 0x1f8   : > { %v2041_v7 = vsel %vm431_vm6, %v2040_v54, %v2026_v17 }
 0x1f9   : > { %v2224_v46 = vpop.permute.xlu0 %2223  ;;  %v2502_v45 = vsel %vm2284_vm7, %v2041_v7, %v2498_v59 }
 0x1fa   : > { %2536 = vmatprep.subr.mxu0 %v2502_v45  ;;  %v2263_v48 = vsel %vm429_vm5, %v2262_v39, %v2224_v46 }
 0x1fb   : > { %v2256_v18 = vpop.permute.xlu1 %2255 }
 0x1fc   : > { %v2271_v1 = vsel %vm431_vm6, %v2270_v14, %v2256_v18 }
 0x1fd   : > { %v2602_v34 = vrot.slane %v2271_v1, 4  ;;  %v1998_v24 = vpop.permute.xlu0 %1997 }
 0x1fe   : > { %v2034_v31 = vsel %vm431_vm6, %v2033_v15, %v1998_v24 }
 0x1ff   : > { %v2228_v38 = vpop.permute.xlu1 %2227  ;;  %v2501_v10 = vsel %vm2284_vm7, %v2034_v31, %v2497_v4  ;;  %v2606_v37 = vsel %vm2284_vm7, %v2041_v7, %v2602_v34 }
 0x200   : > { %v2264_v60 = vsel %vm431_vm6, %v2263_v48, %v2228_v38  ;;  %2537 = vmatpush1.msra.mxu0 %v2501_v10  ;;  %2640 = vmatprep.subr.mxu1 %v2606_v37 }
 0x201   : > { %v2601_v33 = vrot.slane %v2264_v60, 4  ;;  %2538 = vmatprep.subr.mxu0 %v4610_v21 }
 0x202   : > { %2539 = vmatpush1.msra.mxu0 %v2285_v26 }
 0x203   : > { %2866 = vmatmul.mubr.msk.f32.vlgmr.msra.gmra.mxu0 %vm419_vm0, %v2865_v11  ;;  %v2605_v16 = vsel %vm2284_vm7, %v2034_v31, %v2601_v33 }
 0x204   : > { %2641 = vmatpush1.msra.mxu1 %v2605_v16 }
 0x205   : > { %2642 = vmatprep.subr.mxu1 %v4618_v42 }
 0x206   : > { %2643 = vmatpush1.msra.mxu1 %v2395_v53 }
 0x207   : > { %2869 = vmatmul.mubr.msk.f32.vlgmr.msra.gmra.mxu1 %vm419_vm0, %v2868_v61 }
 0x2ab   : > { %v2359_v0 = vpop.f32.mrf.mxu0 }
 0x2ac   : > { %v2364_v21 = vsel %vm2284_vm7, %v2359_v0, 0.0  ;;  %v2370_v35 = vmul.f32 %v2359_v0, %v2359_v0 }
 0x2ad   : > { %v2361_v49 = vpop.f32.mrf.mxu0 }
 0x2ae   : > { %v2365_v20 = vsel %vm2284_vm7, %v2361_v49, 0.0  ;;  %v2371_v51 = vmul.f32 %v2361_v49, %v2361_v49  ;;  %v2380_v23 = vcombine.low %v2359_v0, %v2361_v49  ;;  %v2372_v41 = vsel %vm2284_vm7, %v2370_v35, 0.0 }
 0x2af   : > { %v2470_v62 = vpop.f32.mrf.mxu1  ;;  %v2366_v3 = vadd.f32 %v2365_v20, %v2364_v21 }
 0x2b0   : > { %2382 = vst [vmem:[%s4700_s7] sm:$0xff] %v2380_v23  ;;  %v2475_v42 = vsel %vm2284_vm7, %v2470_v62, 0.0  ;;  %v2481_v36 = vmul.f32 %v2470_v62, %v2470_v62  ;;  %v2373_v40 = vsel %vm2284_vm7, %v2371_v51, 0.0 }
 0x2b1   : > { %v2472_v57 = vpop.f32.mrf.mxu1  ;;  %2367 = vadd.xlane.f32.xlu0 %v2366_v3  ;;  %v2374_v6 = vadd.f32 %v2373_v40, %v2372_v41 }
 0x2b2   : > { %v2476_v26 = vsel %vm2284_vm7, %v2472_v57, 0.0  ;;  %v2482_v47 = vmul.f32 %v2472_v57, %v2472_v57  ;;  %v2491_v22 = vcombine.low %v2470_v62, %v2472_v57  ;;  %v2483_v30 = vsel %vm2284_vm7, %v2481_v36, 0.0 }
 0x2b3   : > { %v2477_v9 = vadd.f32 %v2476_v26, %v2475_v42  ;;  %2375 = vadd.xlane.f32.xlu1 %v2374_v6 }
 0x2b4   : > { %2864 = vst [vmem:[%s4700_s7 + $0x8] sm:$0xff] %v2491_v22  ;;  %v2484_v56 = vsel %vm2284_vm7, %v2482_v47, 0.0 }
 0x2b5   : > { %2478 = vadd.xlane.f32.xlu0 %v2477_v9  ;;  %v2485_v53 = vadd.f32 %v2484_v56, %v2483_v30 }
 0x2b9   : > { %2486 = vadd.xlane.f32.xlu0 %v2485_v53 }
 0x2c3   : > { %v2574_v50 = vpop.f32.mrf.mxu0 }
 0x2c4   : > { %v2585_v2 = vmul.f32 %v2574_v50, %v2574_v50  ;;  %v2579_v55 = vsel %vm2284_vm7, %v2574_v50, 0.0 }
 0x2c5   : > { %v2576_v28 = vpop.f32.mrf.mxu0 }
 0x2c6   : > { %v2580_v32 = vsel %vm2284_vm7, %v2576_v28, 0.0  ;;  %v2586_v52 = vmul.f32 %v2576_v28, %v2576_v28  ;;  %v2595_v58 = vcombine.low %v2574_v50, %v2576_v28  ;;  %v2587_v27 = vsel %vm2284_vm7, %v2585_v2, 0.0 }
 0x2c7   : > { %v2581_v44 = vadd.f32 %v2580_v32, %v2579_v55  ;;  %v2678_v59 = vpop.f32.mrf.mxu1 }
 0x2c8   : > { %v2588_v54 = vsel %vm2284_vm7, %v2586_v52, 0.0  ;;  %2867 = vst [vmem:[%s4700_s7 + $0x10] sm:$0xff] %v2595_v58  ;;  %v2689_v17 = vmul.f32 %v2678_v59, %v2678_v59  ;;  %v2683_v19 = vsel %vm2284_vm7, %v2678_v59, 0.0 }
 0x2c9   : > { %2582 = vadd.xlane.f32.xlu1 %v2581_v44  ;;  %v2680_v7 = vpop.f32.mrf.mxu1  ;;  %v2589_v5 = vadd.f32 %v2588_v54, %v2587_v27 }
 0x2ca   : > { %v2684_v46 = vsel %vm2284_vm7, %v2680_v7, 0.0  ;;  %v2690_v45 = vmul.f32 %v2680_v7, %v2680_v7  ;;  %v2699_v13 = vcombine.low %v2678_v59, %v2680_v7  ;;  %v2691_v29 = vsel %vm2284_vm7, %v2689_v17, 0.0 }
 0x2cb   : > { %v2685_v25 = vadd.f32 %v2684_v46, %v2683_v19  ;;  %2590 = vadd.xlane.f32.xlu0 %v2589_v5 }
 0x2cc   : > { %v2692_v43 = vsel %vm2284_vm7, %v2690_v45, 0.0  ;;  %2870 = vst [vmem:[%s4700_s7 + $0x18] sm:$0xff] %v2699_v13 }
 0x2cd   : > { %2686 = vadd.xlane.f32.xlu1 %v2685_v25  ;;  %v2693_v14 = vadd.f32 %v2692_v43, %v2691_v29 }
 0x2cf   : > { %2694 = vadd.xlane.f32.xlu0 %v2693_v14 }
 0x2d0   : > { %2984 = shalt.err (!%p2981_p5)
}
 0x2d1   : > { %s2985_s15 = scalar_lea.hbm %s4726_s18, 512  ;;  %s2989_s4 = scalar_lea.hbm %s4781_s2, 1024 }
 0x2d2   : > { %p2986_p6 = scmp.ne.s32.totalorder %s4726_s18, %s2985_s15  ;;  %p2990_p10 = scmp.lt.s32.totalorder %s4726_s18, %s4781_s2 }
 0x2d3   : > { %p2991_p11 = scmp.lt.s32.totalorder %s2989_s4, %s2985_s15 }
 0x2d4   : > { %p2987_p7 = pnand %p2986_p6, %p3124_p4 }
 0x2d5   : > { %p2992_p12 = por %p2991_p11, %p2990_p10 }
 0x2d6   : > { %p2988_p9 = pneg %p2987_p7 }
 0x2d8   : > { %p2993_p13 = pnand %p2992_p12, %p2988_p9 }
 0x2da   : > { %2996 = shalt.err (!%p2993_p13)
}
 0x2db   : > { %s3062_s7 = smov 128   ;;  %s3063_s9 = smov 8   ;;  %vm2703_vm8 = vcmask 7168   ;;  %vm2705_vm9 = vcmask 11264  }
 0x2dc   : > { %2878 = dma.vmem_to_hbm [thread:$0]  (%p3124_p4), %s4720_s8, 512, %s4726_s18, %s4730_s19, %s3062_s7, %s3062_s7, %s3063_s9  }
 0x2dd   : > { %s2860_s10 = sshll.u32 %s3141_s26, 2 }
 0x2de   : > { %s218_s22 = scalar_lea.vmem %s4782_s3, %s2860_s10 }
 0x33a   : > { %v2368_v18 = vpop.xlane.xlu0 %2367 }
 0x33c   : > { %v2376_v12 = vpop.xlane.xlu1 %2375 }
 0x33e   : > { %v2479_v8 = vpop.xlane.xlu0 %2478 }
 0x33f   : > { %v2480_v15 = vadd.f32 %v2479_v8, %v2368_v18 }
 0x342   : > { %v2487_v1 = vpop.xlane.xlu0 %2486 }
 0x343   : > { %v2488_v34 = vadd.f32 %v2487_v1, %v2376_v12 }
 0x352   : > { %v2583_v63 = vpop.xlane.xlu1 %2582 }
 0x353   : > { %v2584_v39 = vadd.f32 %v2583_v63, %v2480_v15 }
 0x354   : > { %v2591_v4 = vpop.xlane.xlu0 %2590 }
 0x355   : > { %v2592_v31 = vadd.f32 %v2591_v4, %v2488_v34 }
 0x356   : > { %v2687_v24 = vpop.xlane.xlu1 %2686 }
 0x357   : > { %v2688_v38 = vadd.f32 %v2687_v24, %v2584_v39 }
 0x358   : > { %v2695_v48 = vpop.xlane.xlu0 %2694 }
 0x359   : > { %v2696_v10 = vadd.f32 %v2695_v48, %v2592_v31 }
 0x35b   : > { %v2704_v37 = vsel %vm2703_vm8, %v2688_v38, %v2696_v10 }
 0x35c   : > { %2706 = vst.msk [vmem:[%s218_s22] sm:$0xf] %vm2705_vm9, %v2704_v37 }
 0x35d PF: > { %p2884_p4 = scmp.ge.s32.totalorder %s3047_s17, 2  ;;  %s2748_s8 = sand.u32 1, %s3027_s12  }
 0x35e   : > { %s2749_s26 = scalar_lea.sflag [#allocation3], %s2748_s8 }
 0x35f   : > { %p2881_p0 = pnand %p2884_p4, %p3131_p8 }
 0x361   : > { %p2882_p1 = pneg %p2881_p0 }
 0x363   : > { %3022 = dma.done.wait (%p2882_p1), %s2749_s26, 512  }
 0x364   : > { %3024 = vsyncadd (%p2882_p1), %s2749_s26, 4294966784  ;;  %s17_s17 = sadd.s32 1, %s3047_s17   ;;  %s4918_s12 = smov %s3031_s13 }
 0x365   : > { %p14_p2 = scmp.ge.s32.totalorder %s17_s17, 4   ;;  %s4919_s13 = smov %s3035_s14 }
 0x366   : > { %s4920_s14 = smov %s3137_s25  ;;  %s4921_s15 = smov %s3043_s16 }
 0x367   : > { %s4922_s16 = smov %s4924_s20  ;;  %16 = sbr.rel (!%p14_p2) target bundleno = 4 (0x4), region = 84 }
 0x36c   :  { %2764 = vsyncpa [#allocation3], 1 }
 0x36d   :  { %2766 = vsyncpa [#allocation3 + $0x1], 1 }

</bundles_post_ra>
